<compile_context>
chip_gen: v7x
topology: tpu7x:2x2x1
jax: 0.10.0
libtpu: 0.0.40
codegen_flags: <defaults>
</compile_context>

<pallas_src>
import jax
import jax.numpy as jnp
from jax.experimental import pallas as pl
from jax.experimental.pallas import tpu as pltpu

NUM_CLASSES = 21        # num_classes
EMBED = 21              # self.embedding_size
REPR = 32               # representation_size (inter_channel) -- small synthetic value
DIC_K = 8               # number of dictionary entries (rows of self.dic)
CPAD = 128              # causal-score output padded to a full lane width (unmasked stores)
TILE_M = 256            # row tile: multiple of 256 (v6e MXU) and of 128 (v5e MXU)


def _rowwise_kernel(y_ref, watt_ref, batt_ref, dics_ref,
                    wc1_ref, wc2_ref, wcb_ref, a_ref, b_ref):
    """Row-wise hot path for one tile of TILE_M boxes.

    y    : (TILE_M, R)    box features
    watt : (R, K)         folded attention weight
    batt : (1, K)         folded attention bias
    dics : (K, R)         prior[:, None] * dic
    wc1  : (R, CPAD)      causal_score.weight[:, :R].T  (zero-padded to 128 lanes)
    wc2  : (R, CPAD)      causal_score.weight[:, R:].T  (zero-padded)
    wcb  : (1, CPAD)      causal_score.bias             (zero-padded)
    a    : (TILE_M, CPAD) y-half of the causal score:  y @ wc1
    b    : (TILE_M, CPAD) z-half of the causal score:  z @ wc2 + bc
    """
    y = y_ref[...]

    # attention logits + softmax over the K dictionary entries
    logits = jnp.dot(y, watt_ref[...], preferred_element_type=jnp.float32) + batt_ref[...]
    logits = logits - jnp.max(logits, axis=1, keepdims=True)
    e = jnp.exp(logits)
    att = e / jnp.sum(e, axis=1, keepdims=True)                              # (TILE_M, K)

    # z[i] = sum_k prior[k] * att[i, k] * dic[k]
    z = jnp.dot(att, dics_ref[...], preferred_element_type=jnp.float32)      # (TILE_M, R)

    # causal_score(cat(y[i], z[j])) = a[i] + b[j]
    a_ref[...] = jnp.dot(y, wc1_ref[...], preferred_element_type=jnp.float32)
    b_ref[...] = jnp.dot(z, wc2_ref[...], preferred_element_type=jnp.float32) + wcb_ref[...]


@jax.jit
def _rowwise_ab(x, kp):
    """a/b halves of the causal score for every row of x (all groups batched)."""
    n_total = x.shape[0]
    n_pad = pl.cdiv(n_total, TILE_M) * TILE_M
    x_pad = jnp.zeros((n_pad, REPR), x.dtype).at[:n_total].set(x)

    row = lambda i: (i, 0)          # row-tiled arrays
    const = lambda i: (0, 0)        # whole-array parameters (same block every step)

    flops = 2 * n_pad * (REPR * DIC_K + DIC_K * REPR + 2 * REPR * CPAD)
    bytes_accessed = 4 * (n_pad * REPR + 2 * n_pad * CPAD
                          + 2 * REPR * DIC_K + DIC_K * REPR + 2 * REPR * CPAD + CPAD)

    a_pad, b_pad = pl.pallas_call(
        _rowwise_kernel,
        out_shape=(jax.ShapeDtypeStruct((n_pad, CPAD), jnp.float32),
                   jax.ShapeDtypeStruct((n_pad, CPAD), jnp.float32)),
        grid=(n_pad // TILE_M,),
        in_specs=[
            pl.BlockSpec((TILE_M, REPR), row),       # y
            pl.BlockSpec((REPR, DIC_K), const),      # W_att
            pl.BlockSpec((1, DIC_K), const),         # b_att
            pl.BlockSpec((DIC_K, REPR), const),      # dic_scaled
            pl.BlockSpec((REPR, CPAD), const),       # Wc1 (padded)
            pl.BlockSpec((REPR, CPAD), const),       # Wc2 (padded)
            pl.BlockSpec((1, CPAD), const),          # bc  (padded)
        ],
        out_specs=(pl.BlockSpec((TILE_M, CPAD), row),
                   pl.BlockSpec((TILE_M, CPAD), row)),
        compiler_params=pltpu.CompilerParams(
            dimension_semantics=("parallel",)),      # row tiles split across TCs on v7x
        cost_estimate=pl.CostEstimate(
            flops=flops, transcendentals=n_pad * DIC_K, bytes_accessed=bytes_accessed),
    )(x_pad, kp["w_att"], kp["b_att"], kp["dic_scaled"],
      kp["wc1_pad"], kp["wc2_pad"], kp["wcb_pad"])

    return a_pad[:n_total, :NUM_CLASSES], b_pad[:n_total, :NUM_CLASSES]


def causal_predictor_forward(x, box_size_list, params):
    """Equivalent of CausalPredictor.forward: a list of (n_i*n_i, 21) logits."""
    a, b = _rowwise_ab(x, params["kernel"])          # (N_total, 21) each, single kernel call
    outs = []
    start = 0
    for n in box_size_list:
        ag = a[start:start + n]                      # (n, C)
        bg = b[start:start + n]                      # (n, C)
        # logits[i*n + j] = causal_score(cat(y[i], z[j])) = a[i] + b[j]
        outs.append((ag[:, None, :] + bg[None, :, :]).reshape(n * n, NUM_CLASSES))
        start += n
    return outs


def _reference_forward(x, box_size_list, params):
    """Pure-JAX re-implementation of the PyTorch code (fp32-accurate, for verification)."""
    HI = jax.lax.Precision.HIGHEST
    dic, prior = params["dic"], params["prior"]
    wy_w, wy_b = params["wy_w"], params["wy_b"]
    wz_w, wz_b = params["wz_w"], params["wz_b"]
    wc_w, wc_b = params["wc_w"], params["wc_b"]
    outs = []
    start = 0
    for n in box_size_list:
        y = x[start:start + n]
        start += n
        ey = jnp.dot(y, wy_w.T, precision=HI) + wy_b
        ez = jnp.dot(dic, wz_w.T, precision=HI) + wz_b
        att = jnp.dot(ey, ez.T, precision=HI) / (EMBED ** 0.5)
        att = jax.nn.softmax(att, axis=1)
        z_hat = att[:, :, None] * dic[None, :, :]
        z = jnp.einsum("k,nkr->nr", prior, z_hat, precision=HI)
        y_rep = jnp.repeat(y[:, None, :], n, axis=1)
        z_rep = jnp.repeat(z[None, :, :], n, axis=0)
        xz = jnp.concatenate([y_rep, z_rep], axis=2).reshape(-1, 2 * REPR)
        outs.append(jnp.dot(xz, wc_w.T, precision=HI) + wc_b)
    return outs


def make_params(key):
    """Deterministic parameter init matching the module's __init__ shapes."""
    ks = jax.random.split(key, 5)
    HI = jax.lax.Precision.HIGHEST
    wy_w = 0.02 * jax.random.normal(ks[0], (EMBED, REPR), jnp.float32)            # Wy.weight
    wz_w = 0.02 * jax.random.normal(ks[1], (EMBED, REPR), jnp.float32)            # Wz.weight
    wc_w = 0.01 * jax.random.normal(ks[2], (NUM_CLASSES, 2 * REPR), jnp.float32)  # causal_score.weight
    wy_b = jnp.zeros((EMBED,), jnp.float32)
    wz_b = jnp.zeros((EMBED,), jnp.float32)
    wc_b = jnp.zeros((NUM_CLASSES,), jnp.float32)
    # synthetic stand-ins for np.load(cfg.DIC_FILE)[1:] and np.load(cfg.PRIOR_PROB)
    dic = jax.random.normal(ks[3], (DIC_K, REPR), jnp.float32)
    prior = jax.random.uniform(ks[4], (DIC_K,), jnp.float32)
    prior = prior / jnp.sum(prior)

    # ---- constants folded for the kernel (computed once, fp32-accurate) ----
    ez = jnp.dot(dic, wz_w.T, precision=HI) + wz_b                 # (K, E) = Wz(dic)
    scale = 1.0 / (EMBED ** 0.5)
    w_att = jnp.dot(wy_w.T, ez.T, precision=HI) * scale            # (R, K)
    b_att = jnp.dot(wy_b[None, :], ez.T, precision=HI) * scale     # (1, K)
    dic_scaled = prior[:, None] * dic                              # (K, R)
    wc1_pad = jnp.zeros((REPR, CPAD), jnp.float32).at[:, :NUM_CLASSES].set(wc_w[:, :REPR].T)
    wc2_pad = jnp.zeros((REPR, CPAD), jnp.float32).at[:, :NUM_CLASSES].set(wc_w[:, REPR:].T)
    wcb_pad = jnp.zeros((1, CPAD), jnp.float32).at[0, :NUM_CLASSES].set(wc_b)

    return {
        # raw (PyTorch-layout) params for the reference
        "wy_w": wy_w, "wy_b": wy_b, "wz_w": wz_w, "wz_b": wz_b,
        "wc_w": wc_w, "wc_b": wc_b, "dic": dic, "prior": prior,
        # folded kernel-layout constants
        "kernel": {
            "w_att": w_att, "b_att": b_att, "dic_scaled": dic_scaled,
            "wc1_pad": wc1_pad, "wc2_pad": wc2_pad, "wcb_pad": wcb_pad,
        },
    }


if __name__ == "__main__":
    key = jax.random.PRNGKey(0)
    params = make_params(key)

    # per-proposal box counts (n == 1 is special-cased/debug-printed by the module; skip it)
    box_size_list = [6, 4]
    n_total = sum(box_size_list)
    x = jax.random.normal(jax.random.PRNGKey(1), (n_total, REPR), jnp.float32)

    outs = causal_predictor_forward(x, box_size_list, params)
    outs = [jax.block_until_ready(o) for o in outs]

    refs = _reference_forward(x, box_size_list, params)
    for o, r, n in zip(outs, refs, box_size_list):
        assert o.shape == (n * n, NUM_CLASSES), o.shape
        err = float(jnp.max(jnp.abs(o - r)))
        # Folding Wy/Wz/dic/prior into W_att reassociates the fp32 matmuls, so the
        # result is no longer bit-identical to the unfolded reference; allow a
        # small absolute slack (logit scale here is ~0.1).
        assert err < 1e-3, err

    print("KERNEL_OK")
</pallas_src>

<mosaic_0001>
module attributes {stable_mosaic.version = 11 : i64} {
  func.func @_rowwise_kernel(%arg0: i32, %arg1: memref<256x32xf32, #tpu.memory_space<vmem>>, %arg2: memref<32x8xf32, #tpu.memory_space<vmem>>, %arg3: memref<1x8xf32, #tpu.memory_space<vmem>>, %arg4: memref<8x32xf32, #tpu.memory_space<vmem>>, %arg5: memref<32x128xf32, #tpu.memory_space<vmem>>, %arg6: memref<32x128xf32, #tpu.memory_space<vmem>>, %arg7: memref<1x128xf32, #tpu.memory_space<vmem>>, %arg8: memref<256x128xf32, #tpu.memory_space<vmem>>, %arg9: memref<256x128xf32, #tpu.memory_space<vmem>>) attributes {dimension_semantics = [#tpu.dimension_semantics<parallel>], iteration_bounds = array<i64: 1>, scalar_prefetch = 0 : i64, scratch_operands = 0 : i64, tpu.core_type = #tpu.core_type<tc>, window_params = [{transform_indices = @transform_0, window_bounds = array<i64: 256, 32>}, {pipeline_mode = #tpu.pipeline_mode<synchronous>, transform_indices = @transform_1, window_bounds = array<i64: 32, 8>}, {pipeline_mode = #tpu.pipeline_mode<synchronous>, transform_indices = @transform_2, window_bounds = array<i64: 1, 8>}, {pipeline_mode = #tpu.pipeline_mode<synchronous>, transform_indices = @transform_3, window_bounds = array<i64: 8, 32>}, {pipeline_mode = #tpu.pipeline_mode<synchronous>, transform_indices = @transform_4, window_bounds = array<i64: 32, 128>}, {pipeline_mode = #tpu.pipeline_mode<synchronous>, transform_indices = @transform_5, window_bounds = array<i64: 32, 128>}, {pipeline_mode = #tpu.pipeline_mode<synchronous>, transform_indices = @transform_6, window_bounds = array<i64: 1, 128>}, {transform_indices = @transform_7, window_bounds = array<i64: 256, 128>}, {transform_indices = @transform_8, window_bounds = array<i64: 256, 128>}]} {
    %c0 = arith.constant 0 : index
    %c0_0 = arith.constant 0 : index
    %0 = vector.load %arg1[%c0, %c0_0] : memref<256x32xf32, #tpu.memory_space<vmem>>, vector<256x32xf32>
    %c0_1 = arith.constant 0 : index
    %c0_2 = arith.constant 0 : index
    %1 = vector.load %arg2[%c0_1, %c0_2] : memref<32x8xf32, #tpu.memory_space<vmem>>, vector<32x8xf32>
    %cst = arith.constant dense<0.000000e+00> : vector<256x8xf32>
    %2 = tpu.matmul %0, %1, %cst {dimension_numbers = #tpu.dot_dimension_numbers<[1], [0], [0], [1], [0, 0, 1, 1], [], []>} : vector<256x32xf32>, vector<32x8xf32>, vector<256x8xf32> -> vector<256x8xf32>
    %c0_3 = arith.constant 0 : index
    %c0_4 = arith.constant 0 : index
    %3 = vector.load %arg3[%c0_3, %c0_4] : memref<1x8xf32, #tpu.memory_space<vmem>>, vector<1x8xf32>
    %4 = vector.broadcast %3 : vector<1x8xf32> to vector<256x8xf32>
    %5 = arith.addf %2, %4 : vector<256x8xf32>
    %cst_5 = arith.constant dense<0xFF800000> : vector<256xf32>
    %6 = vector.multi_reduction <maximumf>, %5, %cst_5 [1] : vector<256x8xf32> to vector<256xf32>
    %7 = vector.shape_cast %6 : vector<256xf32> to vector<256x1xf32>
    %8 = vector.broadcast %7 : vector<256x1xf32> to vector<256x8xf32>
    %9 = arith.subf %5, %8 : vector<256x8xf32>
    %10 = math.exp %9 : vector<256x8xf32>
    %cst_6 = arith.constant dense<0.000000e+00> : vector<256xf32>
    %11 = vector.multi_reduction <add>, %10, %cst_6 [1] : vector<256x8xf32> to vector<256xf32>
    %12 = vector.shape_cast %11 : vector<256xf32> to vector<256x1xf32>
    %13 = vector.broadcast %12 : vector<256x1xf32> to vector<256x8xf32>
    %14 = arith.divf %10, %13 : vector<256x8xf32>
    %c0_7 = arith.constant 0 : index
    %c0_8 = arith.constant 0 : index
    %15 = vector.load %arg4[%c0_7, %c0_8] : memref<8x32xf32, #tpu.memory_space<vmem>>, vector<8x32xf32>
    %cst_9 = arith.constant dense<0.000000e+00> : vector<256x32xf32>
    %16 = tpu.matmul %14, %15, %cst_9 {dimension_numbers = #tpu.dot_dimension_numbers<[1], [0], [0], [1], [0, 0, 1, 1], [], []>} : vector<256x8xf32>, vector<8x32xf32>, vector<256x32xf32> -> vector<256x32xf32>
    %c0_10 = arith.constant 0 : index
    %c0_11 = arith.constant 0 : index
    %17 = vector.load %arg5[%c0_10, %c0_11] : memref<32x128xf32, #tpu.memory_space<vmem>>, vector<32x128xf32>
    %cst_12 = arith.constant dense<0.000000e+00> : vector<256x128xf32>
    %18 = tpu.matmul %0, %17, %cst_12 {dimension_numbers = #tpu.dot_dimension_numbers<[1], [0], [0], [1], [0, 0, 1, 1], [], []>} : vector<256x32xf32>, vector<32x128xf32>, vector<256x128xf32> -> vector<256x128xf32>
    %c0_13 = arith.constant 0 : index
    %c0_14 = arith.constant 0 : index
    %19 = vector.load %arg8[%c0_13, %c0_14] : memref<256x128xf32, #tpu.memory_space<vmem>>, vector<256x128xf32>
    tpu.vector_store %arg8[%c0_13, %c0_14], %18 {strides = array<i32>} : memref<256x128xf32, #tpu.memory_space<vmem>>, vector<256x128xf32>,
    %c0_15 = arith.constant 0 : index
    %c0_16 = arith.constant 0 : index
    %20 = vector.load %arg6[%c0_15, %c0_16] : memref<32x128xf32, #tpu.memory_space<vmem>>, vector<32x128xf32>
    %cst_17 = arith.constant dense<0.000000e+00> : vector<256x128xf32>
    %21 = tpu.matmul %16, %20, %cst_17 {dimension_numbers = #tpu.dot_dimension_numbers<[1], [0], [0], [1], [0, 0, 1, 1], [], []>} : vector<256x32xf32>, vector<32x128xf32>, vector<256x128xf32> -> vector<256x128xf32>
    %c0_18 = arith.constant 0 : index
    %c0_19 = arith.constant 0 : index
    %22 = vector.load %arg7[%c0_18, %c0_19] : memref<1x128xf32, #tpu.memory_space<vmem>>, vector<1x128xf32>
    %23 = vector.broadcast %22 : vector<1x128xf32> to vector<256x128xf32>
    %24 = arith.addf %21, %23 : vector<256x128xf32>
    %c0_20 = arith.constant 0 : index
    %c0_21 = arith.constant 0 : index
    %25 = vector.load %arg9[%c0_20, %c0_21] : memref<256x128xf32, #tpu.memory_space<vmem>>, vector<256x128xf32>
    tpu.vector_store %arg9[%c0_20, %c0_21], %24 {strides = array<i32>} : memref<256x128xf32, #tpu.memory_space<vmem>>, vector<256x128xf32>,
    return
  }
  func.func @transform_0(%arg0: i32) -> (i32, i32) {
    %c0_i32 = arith.constant 0 : i32
    %c0_i32_0 = arith.constant 0 : i32
    return %arg0, %c0_i32 : i32, i32
  }
  func.func @transform_1(%arg0: i32) -> (i32, i32) {
    %c0_i32 = arith.constant 0 : i32
    %c0_i32_0 = arith.constant 0 : i32
    %c0_i32_1 = arith.constant 0 : i32
    return %c0_i32, %c0_i32_0 : i32, i32
  }
  func.func @transform_2(%arg0: i32) -> (i32, i32) {
    %c0_i32 = arith.constant 0 : i32
    %c0_i32_0 = arith.constant 0 : i32
    %c0_i32_1 = arith.constant 0 : i32
    return %c0_i32, %c0_i32_0 : i32, i32
  }
  func.func @transform_3(%arg0: i32) -> (i32, i32) {
    %c0_i32 = arith.constant 0 : i32
    %c0_i32_0 = arith.constant 0 : i32
    %c0_i32_1 = arith.constant 0 : i32
    return %c0_i32, %c0_i32_0 : i32, i32
  }
  func.func @transform_4(%arg0: i32) -> (i32, i32) {
    %c0_i32 = arith.constant 0 : i32
    %c0_i32_0 = arith.constant 0 : i32
    %c0_i32_1 = arith.constant 0 : i32
    return %c0_i32, %c0_i32_0 : i32, i32
  }
  func.func @transform_5(%arg0: i32) -> (i32, i32) {
    %c0_i32 = arith.constant 0 : i32
    %c0_i32_0 = arith.constant 0 : i32
    %c0_i32_1 = arith.constant 0 : i32
    return %c0_i32, %c0_i32_0 : i32, i32
  }
  func.func @transform_6(%arg0: i32) -> (i32, i32) {
    %c0_i32 = arith.constant 0 : i32
    %c0_i32_0 = arith.constant 0 : i32
    %c0_i32_1 = arith.constant 0 : i32
    return %c0_i32, %c0_i32_0 : i32, i32
  }
  func.func @transform_7(%arg0: i32) -> (i32, i32) {
    %c0_i32 = arith.constant 0 : i32
    %c0_i32_0 = arith.constant 0 : i32
    return %arg0, %c0_i32 : i32, i32
  }
  func.func @transform_8(%arg0: i32) -> (i32, i32) {
    %c0_i32 = arith.constant 0 : i32
    %c0_i32_0 = arith.constant 0 : i32
    return %arg0, %c0_i32 : i32, i32
  }
}

</mosaic_0001>

<bundles_post_ra>
// kernel: _rowwise_ab.1
= control target key start
LH: loop header
LB: loop body
LE: loop exit
PB: predicated region body
PF: predicated region fallthrough
CT: control target
= control target key end

     0   :  { %vm71_vm0 = vcmask 261120   ;;  %vm393_vm1 = vcmask 64512   ;;  %s3364_s1 = inlined_call_operand.vmem [shape: f32[32,8], index: 1, kind: input, shape index: {}]   ;;  %s3365_s0 = inlined_call_operand.vmem [shape: f32[256,32], index: 0, kind: input, shape index: {}]   ;;  %s3366_s2 = inlined_call_operand.vmem [shape: f32[1,8], index: 2, kind: input, shape index: {}]   ;;  %s3367_s3 = inlined_call_operand.vmem [shape: f32[8,32], index: 3, kind: input, shape index: {}]   ;;  %s3368_s5 = inlined_call_operand.vmem [shape: f32[32,128], index: 5, kind: input, shape index: {}]   ;;  %s3369_s4 = inlined_call_operand.vmem [shape: f32[32,128], index: 4, kind: input, shape index: {}]   ;;  %s3370_s7 = inlined_call_operand.vmem [shape: f32[256,128], index: 7, kind: output, shape index: {0}]   ;;  %s3371_s6 = inlined_call_operand.vmem [shape: f32[1,128], index: 6, kind: input, shape index: {}]   ;;  %s3372_s8 = inlined_call_operand.vmem [shape: f32[256,128], index: 8, kind: output, shape index: {1}]  }
   0x1   :  { %v60_v0 = vld [vmem:[%s3364_s1] sm:$0xff]  ;;  %v61_v1 = vld [vmem:[%s3364_s1 + $0x8] sm:$0xff]  ;;  %v62_v2 = vld [vmem:[%s3364_s1 + $0x10] sm:$0xff] }
   0x2   :  { %v2190_v3 = vpack.c.bf16 %v61_v1, %v60_v0  ;;  %v63_v4 = vld [vmem:[%s3364_s1 + $0x18] sm:$0xff]  ;;  %v28_v5 = vld [vmem:[%s3365_s0] sm:$0xff]  ;;  %v29_v7 = vld [vmem:[%s3365_s0 + $0x8] sm:$0xff] }
   0x3   :  { %v2194_v6 = vpack.c.bf16 %v63_v4, %v62_v2  ;;  %1980 = vmatprep.mubr.msk.f32.mxu0 %vm71_vm0, %v28_v5  ;;  %v30_v8 = vld [vmem:[%s3365_s0 + $0x10] sm:$0xff]  ;;  %v31_v9 = vld [vmem:[%s3365_s0 + $0x18] sm:$0xff]  ;;  %v32_v10 = vld [vmem:[%s3365_s0 + $0x20] sm:$0xff] }
   0x4   :  { %2191 = vmatprep.subr.bf16.mxu0 %v2190_v3  ;;  %v33_v11 = vld [vmem:[%s3365_s0 + $0x28] sm:$0xff]  ;;  %v34_v12 = vld [vmem:[%s3365_s0 + $0x30] sm:$0xff]  ;;  %v35_v13 = vld [vmem:[%s3365_s0 + $0x38] sm:$0xff] }
   0x5   :  { %2193 = vmatpush3.bf16.msra.mxu0 %v2190_v3  ;;  %v36_v14 = vld [vmem:[%s3365_s0 + $0x40] sm:$0xff]  ;;  %v37_v15 = vld [vmem:[%s3365_s0 + $0x48] sm:$0xff]  ;;  %v38_v16 = vld [vmem:[%s3365_s0 + $0x50] sm:$0xff] }
   0x6   :  { %2195 = vmatprep.subr.bf16.mxu0 %v2194_v6  ;;  %v39_v17 = vld [vmem:[%s3365_s0 + $0x58] sm:$0xff]  ;;  %v40_v18 = vld [vmem:[%s3365_s0 + $0x60] sm:$0xff]  ;;  %v41_v19 = vld [vmem:[%s3365_s0 + $0x68] sm:$0xff] }
   0x7   :  { %v42_v20 = vld [vmem:[%s3365_s0 + $0x70] sm:$0xff]  ;;  %v43_v21 = vld [vmem:[%s3365_s0 + $0x78] sm:$0xff]  ;;  %v44_v22 = vld [vmem:[%s3365_s0 + $0x80] sm:$0xff] }
   0x8   :  { %v45_v23 = vld [vmem:[%s3365_s0 + $0x88] sm:$0xff]  ;;  %v46_v24 = vld [vmem:[%s3365_s0 + $0x90] sm:$0xff]  ;;  %v47_v25 = vld [vmem:[%s3365_s0 + $0x98] sm:$0xff] }
   0x9   :  { %2197 = vmatpush3.bf16.msra.mxu0 %v2194_v6  ;;  %v48_v26 = vld [vmem:[%s3365_s0 + $0xa0] sm:$0xff]  ;;  %v49_v27 = vld [vmem:[%s3365_s0 + $0xa8] sm:$0xff]  ;;  %v50_v28 = vld [vmem:[%s3365_s0 + $0xb0] sm:$0xff] }
   0xa   :  { %v51_v29 = vld [vmem:[%s3365_s0 + $0xb8] sm:$0xff]  ;;  %v52_v30 = vld [vmem:[%s3365_s0 + $0xc0] sm:$0xff]  ;;  %v53_v31 = vld [vmem:[%s3365_s0 + $0xc8] sm:$0xff] }
   0xb   :  { %v54_v32 = vld [vmem:[%s3365_s0 + $0xd0] sm:$0xff]  ;;  %v55_v33 = vld [vmem:[%s3365_s0 + $0xd8] sm:$0xff]  ;;  %v56_v34 = vld [vmem:[%s3365_s0 + $0xe0] sm:$0xff] }
   0xc   :  { %1981 = vmatmul.mubr.msk.f32.vlgmr.msra.gmra.mrb[0].mxu0 %vm71_vm0, %v29_v7  ;;  %v57_v35 = vld [vmem:[%s3365_s0 + $0xe8] sm:$0xff]  ;;  %v58_v36 = vld [vmem:[%s3365_s0 + $0xf0] sm:$0xff]  ;;  %v59_v37 = vld [vmem:[%s3365_s0 + $0xf8] sm:$0xff] }
   0xd   :  { %1983 = vmatprep.mubr.msk.f32.mxu0 %vm71_vm0, %v30_v8  ;;  %v2562_v38 = vld [vmem:[%s3366_s2] ss:$0 sm:$0xff] }
  0x10   :  { %1984 = vmatmul.mubr.msk.f32.gmra.mrb[2].mxu0 %vm71_vm0, %v31_v9 }
  0x11   :  { %1986 = vmatprep.mubr.msk.f32.mxu0 %vm71_vm0, %v32_v10 }
  0x14   :  { %1987 = vmatmul.mubr.msk.f32.gmra.mrb[4].mxu0 %vm71_vm0, %v33_v11 }
  0x15   :  { %1989 = vmatprep.mubr.msk.f32.mxu0 %vm71_vm0, %v34_v12 }
  0x18   :  { %1990 = vmatmul.mubr.msk.f32.gmra.mrb[6].mxu0 %vm71_vm0, %v35_v13 }
  0x19   :  { %1992 = vmatprep.mubr.msk.f32.mxu0 %vm71_vm0, %v36_v14 }
  0x1c   :  { %1993 = vmatmul.mubr.msk.f32.gmra.mrb[8].mxu0 %vm71_vm0, %v37_v15 }
  0x1d   :  { %1995 = vmatprep.mubr.msk.f32.mxu0 %vm71_vm0, %v38_v16 }
  0x20   :  { %1996 = vmatmul.mubr.msk.f32.gmra.mrb[10].mxu0 %vm71_vm0, %v39_v17 }
  0x21   :  { %1998 = vmatprep.mubr.msk.f32.mxu0 %vm71_vm0, %v40_v18 }
  0x24   :  { %1999 = vmatmul.mubr.msk.f32.gmra.mrb[12].mxu0 %vm71_vm0, %v41_v19 }
  0x25   :  { %2001 = vmatprep.mubr.msk.f32.mxu0 %vm71_vm0, %v42_v20 }
  0x28   :  { %2002 = vmatmul.mubr.msk.f32.gmra.mrb[14].mxu0 %vm71_vm0, %v43_v21 }
  0x29   :  { %2004 = vmatprep.mubr.msk.f32.mxu0 %vm71_vm0, %v44_v22 }
  0x2c   :  { %2005 = vmatmul.mubr.msk.f32.gmra.mrb[16].mxu0 %vm71_vm0, %v45_v23 }
  0x2d   :  { %2007 = vmatprep.mubr.msk.f32.mxu0 %vm71_vm0, %v46_v24 }
  0x30   :  { %2008 = vmatmul.mubr.msk.f32.gmra.mrb[18].mxu0 %vm71_vm0, %v47_v25 }
  0x31   :  { %2010 = vmatprep.mubr.msk.f32.mxu0 %vm71_vm0, %v48_v26 }
  0x34   :  { %2011 = vmatmul.mubr.msk.f32.gmra.mrb[20].mxu0 %vm71_vm0, %v49_v27 }
  0x35   :  { %2013 = vmatprep.mubr.msk.f32.mxu0 %vm71_vm0, %v50_v28 }
  0x38   :  { %2014 = vmatmul.mubr.msk.f32.gmra.mrb[22].mxu0 %vm71_vm0, %v51_v29 }
  0x39   :  { %2016 = vmatprep.mubr.msk.f32.mxu0 %vm71_vm0, %v52_v30 }
  0x3c   :  { %2017 = vmatmul.mubr.msk.f32.gmra.mrb[24].mxu0 %vm71_vm0, %v53_v31 }
  0x3d   :  { %2019 = vmatprep.mubr.msk.f32.mxu0 %vm71_vm0, %v54_v32 }
  0x40   :  { %2020 = vmatmul.mubr.msk.f32.gmra.mrb[26].mxu0 %vm71_vm0, %v55_v33 }
  0x41   :  { %2022 = vmatprep.mubr.msk.f32.mxu0 %vm71_vm0, %v56_v34 }
  0x44   :  { %2023 = vmatmul.mubr.msk.f32.gmra.mrb[28].mxu0 %vm71_vm0, %v57_v35 }
  0x45   :  { %2025 = vmatprep.mubr.msk.f32.mxu0 %vm71_vm0, %v58_v36 }
  0x48   :  { %2026 = vmatmul.mubr.msk.f32.gmra.mrb[30].mxu0 %vm71_vm0, %v59_v37 }
  0xdf   :  { %v1982_v39 = vpop.f32.mrb[0].mxu0 }
  0xe0   :  { %v234_v40 = vpop.f32.mrb[1].mxu0  ;;  %v2568_v42 = vadd.f32 %v1982_v39, %v2562_v38 }
  0xe1   :  { %v2565_v41 = vadd.f32 %v2562_v38, %v234_v40 }
  0xe2   :  { %v397_v50 = vsel %vm393_vm1, %v2568_v42, -inf }
  0xe3   :  { %v1985_v43 = vpop.f32.mrb[2].mxu0  ;;  %v394_v44 = vsel %vm393_vm1, %v2565_v41, -inf }
  0xe4   :  { %v244_v45 = vpop.f32.mrb[3].mxu0  ;;  %395 = vmax.xlane.f32.xlu0 %v394_v44  ;;  %v2576_v47 = vadd.f32 %v1985_v43, %v2562_v38 }
  0xe5   :  { %v2573_v46 = vadd.f32 %v2562_v38, %v244_v45 }
  0xe6   :  { %v403_v55 = vsel %vm393_vm1, %v2576_v47, -inf }
  0xe7   :  { %v1988_v48 = vpop.f32.mrb[4].mxu0  ;;  %v400_v49 = vsel %vm393_vm1, %v2573_v46, -inf }
  0xe8   :  { %v254_v51 = vpop.f32.mrb[5].mxu0  ;;  %401 = vmax.xlane.f32.xlu1 %v400_v49  ;;  %398 = vmax.xlane.f32.xlu0 %v397_v50  ;;  %v2586_v53 = vadd.f32 %v1988_v48, %v2562_v38 }
  0xe9   :  { %v2583_v52 = vadd.f32 %v2562_v38, %v254_v51 }
  0xea   :  { %v409_v61 = vsel %vm393_vm1, %v2586_v53, -inf }
  0xeb   :  { %v1991_v54 = vpop.f32.mrb[6].mxu0  ;;  %v406_v56 = vsel %vm393_vm1, %v2583_v52, -inf }
  0xec   :  { %v264_v57 = vpop.f32.mrb[7].mxu0  ;;  %404 = vmax.xlane.f32.xlu1 %v403_v55  ;;  %407 = vmax.xlane.f32.xlu0 %v406_v56  ;;  %v2596_v59 = vadd.f32 %v1991_v54, %v2562_v38 }
  0xed   :  { %v2593_v58 = vadd.f32 %v2562_v38, %v264_v57 }
  0xee   :  { %v415_v3 = vsel %vm393_vm1, %v2596_v59, -inf }
  0xef   :  { %v1994_v60 = vpop.f32.mrb[8].mxu0  ;;  %v412_v62 = vsel %vm393_vm1, %v2593_v58, -inf }
  0xf0   :  { %v274_v63 = vpop.f32.mrb[9].mxu0  ;;  %410 = vmax.xlane.f32.xlu1 %v409_v61  ;;  %413 = vmax.xlane.f32.xlu0 %v412_v62  ;;  %v2606_v1 = vadd.f32 %v1994_v60, %v2562_v38 }
  0xf1   :  { %v2603_v0 = vadd.f32 %v2562_v38, %v274_v63 }
  0xf2   :  { %v421_v9 = vsel %vm393_vm1, %v2606_v1, -inf }
  0xf3   :  { %v1997_v2 = vpop.f32.mrb[10].mxu0  ;;  %v418_v4 = vsel %vm393_vm1, %v2603_v0, -inf }
  0xf4   :  { %v284_v5 = vpop.f32.mrb[11].mxu0  ;;  %416 = vmax.xlane.f32.xlu1 %v415_v3  ;;  %419 = vmax.xlane.f32.xlu0 %v418_v4  ;;  %v2616_v7 = vadd.f32 %v1997_v2, %v2562_v38 }
  0xf5   :  { %v2613_v6 = vadd.f32 %v2562_v38, %v284_v5 }
  0xf6   :  { %v427_v15 = vsel %vm393_vm1, %v2616_v7, -inf }
  0xf7   :  { %v2000_v8 = vpop.f32.mrb[12].mxu0  ;;  %v424_v10 = vsel %vm393_vm1, %v2613_v6, -inf }
  0xf8   :  { %v294_v11 = vpop.f32.mrb[13].mxu0  ;;  %422 = vmax.xlane.f32.xlu1 %v421_v9  ;;  %425 = vmax.xlane.f32.xlu0 %v424_v10  ;;  %v2626_v13 = vadd.f32 %v2000_v8, %v2562_v38 }
  0xf9   :  { %v2623_v12 = vadd.f32 %v2562_v38, %v294_v11 }
  0xfa   :  { %v433_v21 = vsel %vm393_vm1, %v2626_v13, -inf }
  0xfb   :  { %v2003_v14 = vpop.f32.mrb[14].mxu0  ;;  %v430_v16 = vsel %vm393_vm1, %v2623_v12, -inf }
  0xfc   :  { %v304_v17 = vpop.f32.mrb[15].mxu0  ;;  %428 = vmax.xlane.f32.xlu1 %v427_v15  ;;  %431 = vmax.xlane.f32.xlu0 %v430_v16  ;;  %v2636_v19 = vadd.f32 %v2003_v14, %v2562_v38 }
  0xfd   :  { %v2633_v18 = vadd.f32 %v2562_v38, %v304_v17 }
  0xfe   :  { %v439_v27 = vsel %vm393_vm1, %v2636_v19, -inf }
  0xff   :  { %v2006_v20 = vpop.f32.mrb[16].mxu0  ;;  %v436_v22 = vsel %vm393_vm1, %v2633_v18, -inf }
 0x100   :  { %v314_v23 = vpop.f32.mrb[17].mxu0  ;;  %434 = vmax.xlane.f32.xlu1 %v433_v21  ;;  %437 = vmax.xlane.f32.xlu0 %v436_v22  ;;  %v2646_v25 = vadd.f32 %v2006_v20, %v2562_v38 }
 0x101   :  { %v2643_v24 = vadd.f32 %v2562_v38, %v314_v23 }
 0x102   :  { %v445_v33 = vsel %vm393_vm1, %v2646_v25, -inf }
 0x103   :  { %v2009_v26 = vpop.f32.mrb[18].mxu0  ;;  %v442_v28 = vsel %vm393_vm1, %v2643_v24, -inf }
 0x104   :  { %v324_v29 = vpop.f32.mrb[19].mxu0  ;;  %440 = vmax.xlane.f32.xlu1 %v439_v27  ;;  %443 = vmax.xlane.f32.xlu0 %v442_v28  ;;  %v2656_v31 = vadd.f32 %v2009_v26, %v2562_v38 }
 0x105   :  { %v2653_v30 = vadd.f32 %v2562_v38, %v324_v29 }
 0x106   :  { %v451_v40 = vsel %vm393_vm1, %v2656_v31, -inf }
 0x107   :  { %v2012_v32 = vpop.f32.mrb[20].mxu0  ;;  %v448_v34 = vsel %vm393_vm1, %v2653_v30, -inf }
 0x108   :  { %v334_v35 = vpop.f32.mrb[21].mxu0  ;;  %446 = vmax.xlane.f32.xlu1 %v445_v33  ;;  %449 = vmax.xlane.f32.xlu0 %v448_v34  ;;  %v2666_v37 = vadd.f32 %v2012_v32, %v2562_v38 }
 0x109   :  { %v2663_v36 = vadd.f32 %v2562_v38, %v334_v35 }
 0x10a   :  { %v457_v50 = vsel %vm393_vm1, %v2666_v37, -inf }
 0x10b   :  { %v2015_v39 = vpop.f32.mrb[22].mxu0  ;;  %v454_v43 = vsel %vm393_vm1, %v2663_v36, -inf }
 0x10c   :  { %v344_v44 = vpop.f32.mrb[23].mxu0  ;;  %452 = vmax.xlane.f32.xlu1 %v451_v40  ;;  %455 = vmax.xlane.f32.xlu0 %v454_v43  ;;  %v2676_v48 = vadd.f32 %v2015_v39, %v2562_v38 }
 0x10d   :  { %v2673_v45 = vadd.f32 %v2562_v38, %v344_v44 }
 0x10e   :  { %v463_v60 = vsel %vm393_vm1, %v2676_v48, -inf }
 0x10f   :  { %v2018_v49 = vpop.f32.mrb[24].mxu0  ;;  %v460_v51 = vsel %vm393_vm1, %v2673_v45, -inf }
 0x110   :  { %v354_v54 = vpop.f32.mrb[25].mxu0  ;;  %458 = vmax.xlane.f32.xlu1 %v457_v50  ;;  %461 = vmax.xlane.f32.xlu0 %v460_v51  ;;  %v2686_v56 = vadd.f32 %v2018_v49, %v2562_v38 }
 0x111   :  { %v2683_v55 = vadd.f32 %v2562_v38, %v354_v54 }
 0x112   :  { %v469_v4 = vsel %vm393_vm1, %v2686_v56, -inf }
 0x113   :  { %v2021_v57 = vpop.f32.mrb[26].mxu0  ;;  %v466_v61 = vsel %vm393_vm1, %v2683_v55, -inf }
 0x114   :  { %v364_v62 = vpop.f32.mrb[27].mxu0  ;;  %464 = vmax.xlane.f32.xlu1 %v463_v60  ;;  %467 = vmax.xlane.f32.xlu0 %v466_v61  ;;  %v2696_v2 = vadd.f32 %v2021_v57, %v2562_v38 }
 0x115   :  { %v2693_v63 = vadd.f32 %v2562_v38, %v364_v62 }
 0x116   :  { %v475_v14 = vsel %vm393_vm1, %v2696_v2, -inf }
 0x117   :  { %v2024_v3 = vpop.f32.mrb[28].mxu0  ;;  %v472_v5 = vsel %vm393_vm1, %v2693_v63, -inf }
 0x118   :  { %v374_v8 = vpop.f32.mrb[29].mxu0  ;;  %470 = vmax.xlane.f32.xlu1 %v469_v4  ;;  %473 = vmax.xlane.f32.xlu0 %v472_v5  ;;  %v2706_v10 = vadd.f32 %v2024_v3, %v2562_v38 }
 0x119   :  { %v2703_v9 = vadd.f32 %v2562_v38, %v374_v8 }
 0x11a   :  { %v481_v21 = vsel %vm393_vm1, %v2706_v10, -inf }
 0x11b   :  { %v2027_v11 = vpop.f32.mrb[30].mxu0  ;;  %v478_v15 = vsel %vm393_vm1, %v2703_v9, -inf }
 0x11c   :  { %v2713_v16 = vadd.f32 %v2027_v11, %v2562_v38  ;;  %v384_v17 = vpop.f32.mrb[31].mxu0  ;;  %476 = vmax.xlane.f32.xlu1 %v475_v14  ;;  %479 = vmax.xlane.f32.xlu0 %v478_v15 }
 0x11d   :  { %v2716_v20 = vadd.f32 %v2562_v38, %v384_v17 }
 0x11e   :  { %v487_v23 = vsel %vm393_vm1, %v2713_v16, -inf }
 0x11f   :  { %v484_v22 = vsel %vm393_vm1, %v2716_v20, -inf }
 0x120   :  { %482 = vmax.xlane.f32.xlu1 %v481_v21  ;;  %485 = vmax.xlane.f32.xlu0 %v484_v22 }
 0x124   :  { %488 = vmax.xlane.f32.xlu1 %v487_v23 }
 0x171   :  { %v396_v26 = vpop.xlane.xlu0 %395 }
 0x172   :  { %v490_v27 = vsub.f32 %v2565_v41, %v396_v26 }
 0x174   :  { %v522_v28 = vmul.f32 1.442695, %v490_v27 }
 0x175   :  { %v402_v29 = vpop.xlane.xlu1 %401  ;;  %v399_v32 = vpop.xlane.xlu0 %398 }
 0x176   :  { %2214 = vpow2.f32 %v522_v28  ;;  %v492_v38 = vsub.f32 %v2573_v46, %v402_v29  ;;  %v491_v33 = vsub.f32 %v2568_v42, %v399_v32 }
 0x178   :  { %v526_v34 = vmul.f32 1.442695, %v492_v38  ;;  %v524_v35 = vmul.f32 1.442695, %v491_v33 }
 0x179   :  { %v405_v39 = vpop.xlane.xlu1 %404  ;;  %v408_v40 = vpop.xlane.xlu0 %407 }
 0x17a   :  { %2216 = vpow2.f32 %v526_v34  ;;  %v493_v43 = vsub.f32 %v2576_v47, %v405_v39  ;;  %v494_v44 = vsub.f32 %v2583_v52, %v408_v40 }
 0x17b   :  { %2218 = vpow2.f32 %v524_v35 }
 0x17c   :  { %v528_v49 = vmul.f32 1.442695, %v493_v43  ;;  %v530_v41 = vmul.f32 1.442695, %v494_v44 }
 0x17d   :  { %v411_v50 = vpop.xlane.xlu1 %410  ;;  %v414_v51 = vpop.xlane.xlu0 %413 }
 0x17e   :  { %2220 = vpow2.f32 %v528_v49  ;;  %v495_v54 = vsub.f32 %v2586_v53, %v411_v50  ;;  %v496_v46 = vsub.f32 %v2593_v58, %v414_v51 }
 0x17f   :  { %2222 = vpow2.f32 %v530_v41 }
 0x180   :  { %v2731_v42 = vpop.eup %2214  ;;  %v532_v57 = vmul.f32 1.442695, %v495_v54  ;;  %v534_v60 = vmul.f32 1.442695, %v496_v46 }
 0x181   :  { %v417_v61 = vpop.xlane.xlu1 %416  ;;  %v420_v62 = vpop.xlane.xlu0 %419  ;;  %v586_v47 = vsel %vm393_vm1, %v2731_v42, 0.0 }
 0x182   :  { %2224 = vpow2.f32 %v532_v57  ;;  %v497_v52 = vsub.f32 %v2596_v59, %v417_v61  ;;  %v498_v3 = vsub.f32 %v2603_v0, %v420_v62  ;;  %587 = vadd.xlane.f32.xlu0 %v586_v47 }
 0x183   :  { %2226 = vpow2.f32 %v534_v60 }
 0x184   :  { %v2737_v53 = vpop.eup %2216  ;;  %v536_v58 = vmul.f32 1.442695, %v497_v52  ;;  %v538_v4 = vmul.f32 1.442695, %v498_v3 }
 0x185   :  { %v2739_v5 = vpop.eup %2218  ;;  %v423_v8 = vpop.xlane.xlu1 %422  ;;  %v592_v14 = vsel %vm393_vm1, %v2737_v53, 0.0 }
 0x186   :  { %v426_v11 = vpop.xlane.xlu0 %425  ;;  %2228 = vpow2.f32 %v536_v58  ;;  %v499_v15 = vsub.f32 %v2606_v1, %v423_v8  ;;  %593 = vadd.xlane.f32.xlu0 %v592_v14  ;;  %v589_v0 = vsel %vm393_vm1, %v2739_v5, 0.0 }
 0x187   :  { %v500_v59 = vsub.f32 %v2613_v6, %v426_v11  ;;  %2230 = vpow2.f32 %v538_v4  ;;  %590 = vadd.xlane.f32.xlu1 %v589_v0 }
 0x188   :  { %v2747_v17 = vpop.eup %2220  ;;  %v540_v21 = vmul.f32 1.442695, %v499_v15 }
 0x189   :  { %v542_v22 = vmul.f32 1.442695, %v500_v59  ;;  %v2749_v23 = vpop.eup %2222  ;;  %v429_v26 = vpop.xlane.xlu1 %428  ;;  %v595_v28 = vsel %vm393_vm1, %v2747_v17, 0.0 }
 0x18a   :  { %v432_v27 = vpop.xlane.xlu0 %431  ;;  %2232 = vpow2.f32 %v540_v21  ;;  %v501_v1 = vsub.f32 %v2616_v7, %v429_v26  ;;  %v598_v29 = vsel %vm393_vm1, %v2749_v23, 0.0 }
 0x18b   :  { %v502_v6 = vsub.f32 %v2623_v12, %v432_v27  ;;  %2234 = vpow2.f32 %v542_v22  ;;  %596 = vadd.xlane.f32.xlu1 %v595_v28  ;;  %599 = vadd.xlane.f32.xlu0 %v598_v29 }
 0x18c   :  { %v2757_v32 = vpop.eup %2224  ;;  %v544_v38 = vmul.f32 1.442695, %v501_v1 }
 0x18d   :  { %v546_v33 = vmul.f32 1.442695, %v502_v6  ;;  %v2759_v34 = vpop.eup %2226  ;;  %v435_v35 = vpop.xlane.xlu1 %434  ;;  %v601_v40 = vsel %vm393_vm1, %v2757_v32, 0.0 }
 0x18e   :  { %v438_v39 = vpop.xlane.xlu0 %437  ;;  %2236 = vpow2.f32 %v544_v38  ;;  %v503_v7 = vsub.f32 %v2626_v13, %v435_v35  ;;  %v604_v43 = vsel %vm393_vm1, %v2759_v34, 0.0  ;;  %v746_v35 = vld [vmem:[%s3367_s3] sm:$0xff] }
 0x18f   :  { %v504_v12 = vsub.f32 %v2633_v18, %v438_v39  ;;  %2238 = vpow2.f32 %v546_v33  ;;  %602 = vadd.xlane.f32.xlu1 %v601_v40  ;;  %605 = vadd.xlane.f32.xlu0 %v604_v43 }
 0x190   :  { %v2767_v44 = vpop.eup %2228  ;;  %v548_v49 = vmul.f32 1.442695, %v503_v7  ;;  %2028 = vmatprep.subr.mxu1 %v746_v35 }
 0x191   :  { %v550_v41 = vmul.f32 1.442695, %v504_v12  ;;  %v2769_v50 = vpop.eup %2230  ;;  %v441_v51 = vpop.xlane.xlu1 %440  ;;  %v607_v46 = vsel %vm393_vm1, %v2767_v44, 0.0  ;;  %2029 = vmatpush3.msra.mxu1 %v746_v35 }
 0x192   :  { %v444_v54 = vpop.xlane.xlu0 %443  ;;  %2240 = vpow2.f32 %v548_v49  ;;  %v505_v13 = vsub.f32 %v2636_v19, %v441_v51  ;;  %v610_v57 = vsel %vm393_vm1, %v2769_v50, 0.0 }
 0x193   :  { %v506_v18 = vsub.f32 %v2643_v24, %v444_v54  ;;  %2242 = vpow2.f32 %v550_v41  ;;  %608 = vadd.xlane.f32.xlu1 %v607_v46  ;;  %611 = vadd.xlane.f32.xlu0 %v610_v57 }
 0x194   :  { %v2777_v60 = vpop.eup %2232  ;;  %v552_v61 = vmul.f32 1.442695, %v505_v13 }
 0x195   :  { %v554_v62 = vmul.f32 1.442695, %v506_v18  ;;  %v2779_v47 = vpop.eup %2234  ;;  %v447_v52 = vpop.xlane.xlu1 %446  ;;  %v613_v58 = vsel %vm393_vm1, %v2777_v60, 0.0 }
 0x196   :  { %v450_v3 = vpop.xlane.xlu0 %449  ;;  %2244 = vpow2.f32 %v552_v61  ;;  %v507_v19 = vsub.f32 %v2646_v25, %v447_v52  ;;  %v616_v4 = vsel %vm393_vm1, %v2779_v47, 0.0 }
 0x197   :  { %v508_v24 = vsub.f32 %v2653_v30, %v450_v3  ;;  %2246 = vpow2.f32 %v554_v62  ;;  %614 = vadd.xlane.f32.xlu1 %v613_v58  ;;  %617 = vadd.xlane.f32.xlu0 %v616_v4 }
 0x198   :  { %v2787_v8 = vpop.eup %2236  ;;  %v556_v11 = vmul.f32 1.442695, %v507_v19 }
 0x199   :  { %v558_v14 = vmul.f32 1.442695, %v508_v24  ;;  %v2789_v15 = vpop.eup %2238  ;;  %v453_v59 = vpop.xlane.xlu1 %452  ;;  %v619_v21 = vsel %vm393_vm1, %v2787_v8, 0.0 }
 0x19a   :  { %v456_v0 = vpop.xlane.xlu0 %455  ;;  %2248 = vpow2.f32 %v556_v11  ;;  %v509_v25 = vsub.f32 %v2656_v31, %v453_v59  ;;  %v622_v22 = vsel %vm393_vm1, %v2789_v15, 0.0 }
 0x19b   :  { %v510_v30 = vsub.f32 %v2663_v36, %v456_v0  ;;  %2250 = vpow2.f32 %v558_v14  ;;  %620 = vadd.xlane.f32.xlu1 %v619_v21  ;;  %623 = vadd.xlane.f32.xlu0 %v622_v22 }
 0x19c   :  { %v2797_v26 = vpop.eup %2240  ;;  %v560_v27 = vmul.f32 1.442695, %v509_v25 }
 0x19d   :  { %v562_v28 = vmul.f32 1.442695, %v510_v30  ;;  %v2799_v1 = vpop.eup %2242  ;;  %v459_v6 = vpop.xlane.xlu1 %458  ;;  %v625_v38 = vsel %vm393_vm1, %v2797_v26, 0.0 }
 0x19e   :  { %v462_v29 = vpop.xlane.xlu0 %461  ;;  %2252 = vpow2.f32 %v560_v27  ;;  %v511_v31 = vsub.f32 %v2666_v37, %v459_v6  ;;  %v628_v33 = vsel %vm393_vm1, %v2799_v1, 0.0 }
 0x19f   :  { %v512_v36 = vsub.f32 %v2673_v45, %v462_v29  ;;  %2254 = vpow2.f32 %v562_v28  ;;  %626 = vadd.xlane.f32.xlu1 %v625_v38  ;;  %629 = vadd.xlane.f32.xlu0 %v628_v33 }
 0x1a0   :  { %v2810_v39 = vpop.eup %2244  ;;  %v564_v40 = vmul.f32 1.442695, %v511_v31 }
 0x1a1   :  { %v566_v7 = vmul.f32 1.442695, %v512_v36  ;;  %v2812_v12 = vpop.eup %2246  ;;  %v465_v37 = vpop.xlane.xlu1 %464  ;;  %v631_v45 = vsel %vm393_vm1, %v2810_v39, 0.0 }
 0x1a2   :  { %v468_v43 = vpop.xlane.xlu0 %467  ;;  %2256 = vpow2.f32 %v564_v40  ;;  %v513_v49 = vsub.f32 %v2676_v48, %v465_v37  ;;  %v634_v51 = vsel %vm393_vm1, %v2812_v12, 0.0 }
 0x1a3   :  { %v514_v41 = vsub.f32 %v2683_v55, %v468_v43  ;;  %2258 = vpow2.f32 %v566_v7  ;;  %632 = vadd.xlane.f32.xlu1 %v631_v45  ;;  %635 = vadd.xlane.f32.xlu0 %v634_v51 }
 0x1a4   :  { %v2820_v54 = vpop.eup %2248  ;;  %v568_v46 = vmul.f32 1.442695, %v513_v49 }
 0x1a5   :  { %v570_v13 = vmul.f32 1.442695, %v514_v41  ;;  %v2822_v18 = vpop.eup %2250  ;;  %v471_v57 = vpop.xlane.xlu1 %470  ;;  %v637_v62 = vsel %vm393_vm1, %v2820_v54, 0.0 }
 0x1a6   :  { %v474_v61 = vpop.xlane.xlu0 %473  ;;  %2260 = vpow2.f32 %v568_v46  ;;  %v515_v48 = vsub.f32 %v2686_v56, %v471_v57  ;;  %v640_v52 = vsel %vm393_vm1, %v2822_v18, 0.0 }
 0x1a7   :  { %v516_v55 = vsub.f32 %v2693_v63, %v474_v61  ;;  %2262 = vpow2.f32 %v570_v13  ;;  %638 = vadd.xlane.f32.xlu1 %v637_v62  ;;  %641 = vadd.xlane.f32.xlu0 %v640_v52  ;;  %v1330_v52 = vld [vmem:[%s3368_s5 + $0x8] sm:$0xff] }
 0x1a8   :  { %v2830_v3 = vpop.eup %2252  ;;  %v572_v58 = vmul.f32 1.442695, %v515_v48 }
 0x1a9   :  { %v574_v19 = vmul.f32 1.442695, %v516_v55  ;;  %v2832_v24 = vpop.eup %2254  ;;  %v477_v4 = vpop.xlane.xlu1 %476  ;;  %v643_v14 = vsel %vm393_vm1, %v2830_v3, 0.0  ;;  %v1329_v55 = vld [vmem:[%s3368_s5] sm:$0xff] }
 0x1aa   :  { %v480_v11 = vpop.xlane.xlu0 %479  ;;  %2264 = vpow2.f32 %v572_v58  ;;  %v517_v56 = vsub.f32 %v2696_v2, %v477_v4  ;;  %v646_v59 = vsel %vm393_vm1, %v2832_v24, 0.0  ;;  %v1068_v58 = vld [vmem:[%s3369_s4] sm:$0xff]  ;;  %v1069_v4 = vld [vmem:[%s3369_s4 + $0x8] sm:$0xff] }
 0x1ab   :  { %v518_v63 = vsub.f32 %v2703_v9, %v480_v11  ;;  %2266 = vpow2.f32 %v574_v19  ;;  %644 = vadd.xlane.f32.xlu1 %v643_v14  ;;  %647 = vadd.xlane.f32.xlu0 %v646_v59  ;;  %v2206_v19 = vpack.c.bf16 %v1330_v52, %v1329_v55  ;;  %v1331_v11 = vld [vmem:[%s3368_s5 + $0x10] sm:$0xff]  ;;  %v1332_v14 = vld [vmem:[%s3368_s5 + $0x18] sm:$0xff] }
 0x1ac   :  { %v2840_v0 = vpop.eup %2256  ;;  %v576_v21 = vmul.f32 1.442695, %v517_v56  ;;  %v2198_v56 = vpack.c.bf16 %v1069_v4, %v1068_v58 }
 0x1ad   :  { %v578_v25 = vmul.f32 1.442695, %v518_v63  ;;  %v2842_v30 = vpop.eup %2258  ;;  %v483_v22 = vpop.xlane.xlu1 %482  ;;  %v649_v28 = vsel %vm393_vm1, %v2840_v0, 0.0  ;;  %v2210_v63 = vpack.c.bf16 %v1332_v14, %v1331_v11  ;;  %2207 = vmatprep.subr.bf16.mxu0 %v2206_v19 }
 0x1ae   :  { %v486_v27 = vpop.xlane.xlu0 %485  ;;  %2268 = vpow2.f32 %v576_v21  ;;  %v519_v2 = vsub.f32 %v2706_v10, %v483_v22  ;;  %v652_v6 = vsel %vm393_vm1, %v2842_v30, 0.0  ;;  %2209 = vmatpush3.bf16.msra.mxu0 %v2206_v19  ;;  %2199 = vmatprep.subr.bf16.mxu1 %v2198_v56 }
 0x1af   :  { %v520_v9 = vsub.f32 %v2716_v20, %v486_v27  ;;  %2270 = vpow2.f32 %v578_v25  ;;  %650 = vadd.xlane.f32.xlu1 %v649_v28  ;;  %653 = vadd.xlane.f32.xlu0 %v652_v6 }
 0x1b0   :  { %v2850_v29 = vpop.eup %2260  ;;  %v580_v38 = vmul.f32 1.442695, %v519_v2  ;;  %2211 = vmatprep.subr.bf16.mxu0 %v2210_v63 }
 0x1b1   :  { %v582_v31 = vmul.f32 1.442695, %v520_v9  ;;  %v2852_v36 = vpop.eup %2262  ;;  %v489_v33 = vpop.xlane.xlu1 %488  ;;  %v655_v35 = vsel %vm393_vm1, %v2850_v29, 0.0 }
 0x1b2   :  { %2272 = vpow2.f32 %v580_v38  ;;  %v521_v10 = vsub.f32 %v2713_v16, %v489_v33  ;;  %v658_v20 = vsel %vm393_vm1, %v2852_v36, 0.0  ;;  %2213 = vmatpush3.bf16.msra.mxu0 %v2210_v63  ;;  %v1070_v38 = vld [vmem:[%s3369_s4 + $0x10] sm:$0xff] }
 0x1b3   :  { %2274 = vpow2.f32 %v582_v31  ;;  %656 = vadd.xlane.f32.xlu1 %v655_v35  ;;  %659 = vadd.xlane.f32.xlu0 %v658_v20  ;;  %v1071_v31 = vld [vmem:[%s3369_s4 + $0x18] sm:$0xff] }
 0x1b4   :  { %v2859_v40 = vpop.eup %2264  ;;  %v584_v7 = vmul.f32 1.442695, %v521_v10 }
 0x1b5   :  { %v2861_v37 = vpop.eup %2266  ;;  %v661_v43 = vsel %vm393_vm1, %v2859_v40, 0.0 }
 0x1b6   :  { %2276 = vpow2.f32 %v584_v7  ;;  %v664_v45 = vsel %vm393_vm1, %v2861_v37, 0.0 }
 0x1b7   :  { %662 = vadd.xlane.f32.xlu1 %v661_v43  ;;  %665 = vadd.xlane.f32.xlu0 %v664_v45  ;;  %v2202_v43 = vpack.c.bf16 %v1071_v31, %v1070_v38 }
 0x1b8   :  { %v2867_v16 = vpop.eup %2268 }
 0x1b9   :  { %v2869_v49 = vpop.eup %2270  ;;  %v667_v41 = vsel %vm393_vm1, %v2867_v16, 0.0 }
 0x1ba   :  { %v670_v51 = vsel %vm393_vm1, %v2869_v49, 0.0 }
 0x1bb   :  { %668 = vadd.xlane.f32.xlu1 %v667_v41  ;;  %671 = vadd.xlane.f32.xlu0 %v670_v51 }
 0x1bc   :  { %v2875_v46 = vpop.eup %2272 }
 0x1bd   :  { %v2877_v13 = vpop.eup %2274  ;;  %v673_v57 = vsel %vm393_vm1, %v2875_v46, 0.0 }
 0x1be   :  { %v676_v61 = vsel %vm393_vm1, %v2877_v13, 0.0 }
 0x1bf   :  { %674 = vadd.xlane.f32.xlu1 %v673_v57  ;;  %677 = vadd.xlane.f32.xlu0 %v676_v61 }
 0x1c0   :  { %v2883_v62 = vpop.eup %2276 }
 0x1c1   :  { %v679_v48 = vsel %vm393_vm1, %v2883_v62, 0.0 }
 0x1c3   :  { %680 = vadd.xlane.f32.xlu1 %v679_v48 }
 0x20f   :  { %v588_v59 = vpop.xlane.xlu0 %587 }
 0x210   :  { %2278 = vrcp.f32 %v588_v59 }
 0x213   :  { %v594_v21 = vpop.xlane.xlu0 %593 }
 0x214   :  { %v591_v25 = vpop.xlane.xlu1 %590  ;;  %2280 = vrcp.f32 %v594_v21 }
 0x215   :  { %2282 = vrcp.f32 %v591_v25 }
 0x218   :  { %v597_v22 = vpop.xlane.xlu1 %596  ;;  %v600_v27 = vpop.xlane.xlu0 %599 }
 0x219   :  { %2284 = vrcp.f32 %v597_v22 }
 0x21a   :  { %v2279_v28 = vpop.eup %2278  ;;  %2286 = vrcp.f32 %v600_v27 }
 0x21b   :  { %v683_v2 = vmul.f32 %v2279_v28, %v2731_v42 }
 0x21c   :  { %v603_v9 = vpop.xlane.xlu1 %602  ;;  %v606_v6 = vpop.xlane.xlu0 %605 }
 0x21d   :  { %2288 = vrcp.f32 %v603_v9  ;;  %2030 = vmatprep.mubr.msk.f32.mxu1 %vm393_vm1, %v683_v2 }
 0x21e   :  { %v2281_v33 = vpop.eup %2280  ;;  %2290 = vrcp.f32 %v606_v6 }
 0x21f   :  { %v2283_v35 = vpop.eup %2282  ;;  %v687_v10 = vmul.f32 %v2281_v33, %v2737_v53 }
 0x220   :  { %v609_v20 = vpop.xlane.xlu1 %608  ;;  %v612_v42 = vpop.xlane.xlu0 %611  ;;  %v685_v7 = vmul.f32 %v2283_v35, %v2739_v5 }
 0x221   :  { %2292 = vrcp.f32 %v609_v20 }
 0x222   :  { %2294 = vrcp.f32 %v612_v42  ;;  %2031 = vmatmul.mubr.msk.f32.vlgmr.msra.gmra.mrb[0].mxu1 %vm393_vm1, %v685_v7 }
 0x223   :  { %v2285_v45 = vpop.eup %2284  ;;  %2033 = vmatprep.mubr.msk.f32.mxu1 %vm393_vm1, %v687_v10  ;;  %2201 = vmatpush3.bf16.msra.mxu1 %v2198_v56 }
 0x224   :  { %v2287_v41 = vpop.eup %2286  ;;  %v615_v51 = vpop.xlane.xlu1 %614  ;;  %v689_v61 = vmul.f32 %v2285_v45, %v2747_v17  ;;  %2203 = vmatprep.subr.bf16.mxu1 %v2202_v43 }
 0x225   :  { %v618_v57 = vpop.xlane.xlu0 %617  ;;  %2296 = vrcp.f32 %v615_v51  ;;  %v691_v53 = vmul.f32 %v2287_v41, %v2749_v23 }
 0x226   :  { %2298 = vrcp.f32 %v618_v57  ;;  %2034 = vmatmul.mubr.msk.f32.gmra.mrb[2].mxu1 %vm393_vm1, %v689_v61 }
 0x227   :  { %v2289_v5 = vpop.eup %2288  ;;  %2036 = vmatprep.mubr.msk.f32.mxu1 %vm393_vm1, %v691_v53  ;;  %2205 = vmatpush3.bf16.msra.mxu1 %v2202_v43 }
 0x228   :  { %v2291_v48 = vpop.eup %2290  ;;  %v621_v55 = vpop.xlane.xlu1 %620  ;;  %v693_v58 = vmul.f32 %v2289_v5, %v2757_v32 }
 0x229   :  { %v624_v52 = vpop.xlane.xlu0 %623  ;;  %2300 = vrcp.f32 %v621_v55  ;;  %v695_v19 = vmul.f32 %v2291_v48, %v2759_v34 }
 0x22a   :  { %2302 = vrcp.f32 %v624_v52  ;;  %2037 = vmatmul.mubr.msk.f32.gmra.mrb[4].mxu1 %vm393_vm1, %v693_v58 }
 0x22b   :  { %v2293_v17 = vpop.eup %2292  ;;  %2039 = vmatprep.mubr.msk.f32.mxu1 %vm393_vm1, %v695_v19 }
 0x22c   :  { %v2295_v23 = vpop.eup %2294  ;;  %v627_v4 = vpop.xlane.xlu1 %626  ;;  %v697_v14 = vmul.f32 %v2293_v17, %v2767_v44 }
 0x22d   :  { %v630_v11 = vpop.xlane.xlu0 %629  ;;  %2304 = vrcp.f32 %v627_v4  ;;  %v699_v56 = vmul.f32 %v2295_v23, %v2769_v50 }
 0x22e   :  { %2306 = vrcp.f32 %v630_v11  ;;  %2040 = vmatmul.mubr.msk.f32.gmra.mrb[6].mxu1 %vm393_vm1, %v697_v14 }
 0x22f   :  { %v2297_v32 = vpop.eup %2296  ;;  %2042 = vmatprep.mubr.msk.f32.mxu1 %vm393_vm1, %v699_v56 }
 0x230   :  { %v2299_v34 = vpop.eup %2298  ;;  %v633_v63 = vpop.xlane.xlu1 %632  ;;  %v701_v21 = vmul.f32 %v2297_v32, %v2777_v60 }
 0x231   :  { %v636_v59 = vpop.xlane.xlu0 %635  ;;  %2308 = vrcp.f32 %v633_v63  ;;  %v703_v25 = vmul.f32 %v2299_v34, %v2779_v47 }
 0x232   :  { %2310 = vrcp.f32 %v636_v59  ;;  %2043 = vmatmul.mubr.msk.f32.gmra.mrb[8].mxu1 %vm393_vm1, %v701_v21  ;;  %v2347_v21 = vld [vmem:[%s3365_s0 + $0x28] sm:$0xff] }
 0x233   :  { %v2301_v44 = vpop.eup %2300  ;;  %2045 = vmatprep.mubr.msk.f32.mxu1 %vm393_vm1, %v703_v25  ;;  %v2348_v25 = vld [vmem:[%s3365_s0 + $0x30] sm:$0xff] }
 0x234   :  { %v2303_v50 = vpop.eup %2302  ;;  %v639_v22 = vpop.xlane.xlu1 %638  ;;  %v705_v28 = vmul.f32 %v2301_v44, %v2787_v8  ;;  %v2349_v44 = vld [vmem:[%s3365_s0 + $0x38] sm:$0xff] }
 0x235   :  { %v642_v27 = vpop.xlane.xlu0 %641  ;;  %2312 = vrcp.f32 %v639_v22  ;;  %v707_v2 = vmul.f32 %v2303_v50, %v2789_v15  ;;  %v2350_v50 = vld [vmem:[%s3365_s0 + $0x40] sm:$0xff]  ;;  %v2351_v22 = vld [vmem:[%s3365_s0 + $0x48] sm:$0xff] }
 0x236   :  { %2314 = vrcp.f32 %v642_v27  ;;  %2046 = vmatmul.mubr.msk.f32.gmra.mrb[10].mxu1 %vm393_vm1, %v705_v28  ;;  %v2352_v27 = vld [vmem:[%s3365_s0 + $0x50] sm:$0xff]  ;;  %v2353_v28 = vld [vmem:[%s3365_s0 + $0x58] sm:$0xff] }
 0x237   :  { %v2305_v60 = vpop.eup %2304  ;;  %2048 = vmatprep.mubr.msk.f32.mxu1 %vm393_vm1, %v707_v2  ;;  %v2354_v2 = vld [vmem:[%s3365_s0 + $0x60] sm:$0xff] }
 0x238   :  { %v2307_v47 = vpop.eup %2306  ;;  %v645_v9 = vpop.xlane.xlu1 %644  ;;  %v709_v38 = vmul.f32 %v2305_v60, %v2797_v26  ;;  %v2355_v60 = vld [vmem:[%s3365_s0 + $0x68] sm:$0xff] }
 0x239   :  { %v648_v6 = vpop.xlane.xlu0 %647  ;;  %2316 = vrcp.f32 %v645_v9  ;;  %v711_v31 = vmul.f32 %v2307_v47, %v2799_v1  ;;  %v2356_v47 = vld [vmem:[%s3365_s0 + $0x70] sm:$0xff]  ;;  %v2357_v9 = vld [vmem:[%s3365_s0 + $0x78] sm:$0xff] }
 0x23a   :  { %2318 = vrcp.f32 %v648_v6  ;;  %2049 = vmatmul.mubr.msk.f32.gmra.mrb[12].mxu1 %vm393_vm1, %v709_v38  ;;  %v2358_v6 = vld [vmem:[%s3365_s0 + $0x80] sm:$0xff]  ;;  %v2359_v38 = vld [vmem:[%s3365_s0 + $0x88] sm:$0xff] }
 0x23b   :  { %v2309_v8 = vpop.eup %2308  ;;  %2051 = vmatprep.mubr.msk.f32.mxu1 %vm393_vm1, %v711_v31  ;;  %v2360_v31 = vld [vmem:[%s3365_s0 + $0x90] sm:$0xff] }
 0x23c   :  { %v2311_v15 = vpop.eup %2310  ;;  %v651_v33 = vpop.xlane.xlu1 %650  ;;  %v713_v10 = vmul.f32 %v2309_v8, %v2810_v39  ;;  %v2361_v8 = vld [vmem:[%s3365_s0 + $0x98] sm:$0xff] }
 0x23d   :  { %v654_v35 = vpop.xlane.xlu0 %653  ;;  %2320 = vrcp.f32 %v651_v33  ;;  %v715_v20 = vmul.f32 %v2311_v15, %v2812_v12  ;;  %v2362_v15 = vld [vmem:[%s3365_s0 + $0xa0] sm:$0xff]  ;;  %v2363_v33 = vld [vmem:[%s3365_s0 + $0xa8] sm:$0xff] }
 0x23e   :  { %2322 = vrcp.f32 %v654_v35  ;;  %2052 = vmatmul.mubr.msk.f32.gmra.mrb[14].mxu1 %vm393_vm1, %v713_v10  ;;  %v2364_v35 = vld [vmem:[%s3365_s0 + $0xb0] sm:$0xff]  ;;  %v2365_v10 = vld [vmem:[%s3365_s0 + $0xb8] sm:$0xff] }
 0x23f   :  { %v2313_v26 = vpop.eup %2312  ;;  %2054 = vmatprep.mubr.msk.f32.mxu1 %vm393_vm1, %v715_v20  ;;  %v2366_v20 = vld [vmem:[%s3365_s0 + $0xc0] sm:$0xff] }
 0x240   :  { %v2315_v1 = vpop.eup %2314  ;;  %v657_v42 = vpop.xlane.xlu1 %656  ;;  %v717_v43 = vmul.f32 %v2313_v26, %v2820_v54  ;;  %v2367_v26 = vld [vmem:[%s3365_s0 + $0xc8] sm:$0xff] }
 0x241   :  { %v660_v7 = vpop.xlane.xlu0 %659  ;;  %2324 = vrcp.f32 %v657_v42  ;;  %v719_v45 = vmul.f32 %v2315_v1, %v2822_v18  ;;  %v2368_v1 = vld [vmem:[%s3365_s0 + $0xd0] sm:$0xff]  ;;  %v2369_v42 = vld [vmem:[%s3365_s0 + $0xd8] sm:$0xff] }
 0x242   :  { %2326 = vrcp.f32 %v660_v7  ;;  %2055 = vmatmul.mubr.msk.f32.gmra.mrb[16].mxu1 %vm393_vm1, %v717_v43  ;;  %v2370_v7 = vld [vmem:[%s3365_s0 + $0xe0] sm:$0xff]  ;;  %v2371_v43 = vld [vmem:[%s3365_s0 + $0xe8] sm:$0xff] }
 0x243   :  { %v2317_v39 = vpop.eup %2316  ;;  %2057 = vmatprep.mubr.msk.f32.mxu1 %vm393_vm1, %v719_v45  ;;  %v2372_v45 = vld [vmem:[%s3365_s0 + $0xf0] sm:$0xff] }
 0x244   :  { %v2319_v12 = vpop.eup %2318  ;;  %v663_v41 = vpop.xlane.xlu1 %662  ;;  %v721_v57 = vmul.f32 %v2317_v39, %v2830_v3  ;;  %v2373_v39 = vld [vmem:[%s3365_s0 + $0xf8] sm:$0xff] }
 0x245   :  { %v666_v51 = vpop.xlane.xlu0 %665  ;;  %2328 = vrcp.f32 %v663_v41  ;;  %v723_v61 = vmul.f32 %v2319_v12, %v2832_v24 }
 0x246   :  { %2330 = vrcp.f32 %v666_v51  ;;  %2058 = vmatmul.mubr.msk.f32.gmra.mrb[18].mxu1 %vm393_vm1, %v721_v57 }
 0x247   :  { %v2321_v54 = vpop.eup %2320  ;;  %2060 = vmatprep.mubr.msk.f32.mxu1 %vm393_vm1, %v723_v61 }
 0x248   :  { %v2323_v18 = vpop.eup %2322  ;;  %v669_v53 = vpop.xlane.xlu1 %668  ;;  %v725_v48 = vmul.f32 %v2321_v54, %v2840_v0 }
 0x249   :  { %v672_v5 = vpop.xlane.xlu0 %671  ;;  %2332 = vrcp.f32 %v669_v53  ;;  %v727_v55 = vmul.f32 %v2323_v18, %v2842_v30 }
 0x24a   :  { %2334 = vrcp.f32 %v672_v5  ;;  %2061 = vmatmul.mubr.msk.f32.gmra.mrb[20].mxu1 %vm393_vm1, %v725_v48 }
 0x24b   :  { %v2325_v3 = vpop.eup %2324  ;;  %2063 = vmatprep.mubr.msk.f32.mxu1 %vm393_vm1, %v727_v55 }
 0x24c   :  { %v2327_v24 = vpop.eup %2326  ;;  %v675_v52 = vpop.xlane.xlu1 %674  ;;  %v729_v19 = vmul.f32 %v2325_v3, %v2850_v29 }
 0x24d   :  { %v678_v58 = vpop.xlane.xlu0 %677  ;;  %2336 = vrcp.f32 %v675_v52  ;;  %v731_v17 = vmul.f32 %v2327_v24, %v2852_v36 }
 0x24e   :  { %2338 = vrcp.f32 %v678_v58  ;;  %2064 = vmatmul.mubr.msk.f32.gmra.mrb[22].mxu1 %vm393_vm1, %v729_v19 }
 0x24f   :  { %v2329_v0 = vpop.eup %2328  ;;  %2066 = vmatprep.mubr.msk.f32.mxu1 %vm393_vm1, %v731_v17 }
 0x250   :  { %v2331_v30 = vpop.eup %2330  ;;  %v681_v23 = vpop.xlane.xlu1 %680  ;;  %v733_v4 = vmul.f32 %v2329_v0, %v2859_v40 }
 0x251   :  { %2340 = vrcp.f32 %v681_v23  ;;  %v735_v11 = vmul.f32 %v2331_v30, %v2861_v37 }
 0x252   :  { %2067 = vmatmul.mubr.msk.f32.gmra.mrb[24].mxu1 %vm393_vm1, %v733_v4 }
 0x253   :  { %v2333_v14 = vpop.eup %2332  ;;  %2069 = vmatprep.mubr.msk.f32.mxu1 %vm393_vm1, %v735_v11 }
 0x254   :  { %v2335_v29 = vpop.eup %2334  ;;  %v737_v36 = vmul.f32 %v2333_v14, %v2867_v16  ;;  %v2342_v16 = vld [vmem:[%s3365_s0] sm:$0xff] }
 0x255   :  { %v739_v56 = vmul.f32 %v2335_v29, %v2869_v49  ;;  %v2343_v49 = vld [vmem:[%s3365_s0 + $0x8] sm:$0xff] }
 0x256   :  { %2070 = vmatmul.mubr.msk.f32.gmra.mrb[26].mxu1 %vm393_vm1, %v737_v36 }
 0x257   :  { %v2337_v32 = vpop.eup %2336  ;;  %2072 = vmatprep.mubr.msk.f32.mxu1 %vm393_vm1, %v739_v56 }
 0x258   :  { %v2339_v34 = vpop.eup %2338  ;;  %v741_v40 = vmul.f32 %v2337_v32, %v2875_v46  ;;  %v2344_v46 = vld [vmem:[%s3365_s0 + $0x10] sm:$0xff] }
 0x259   :  { %v743_v37 = vmul.f32 %v2339_v34, %v2877_v13  ;;  %v2345_v13 = vld [vmem:[%s3365_s0 + $0x18] sm:$0xff] }
 0x25a   :  { %2073 = vmatmul.mubr.msk.f32.gmra.mrb[28].mxu1 %vm393_vm1, %v741_v40 }
 0x25b   :  { %v2341_v63 = vpop.eup %2340  ;;  %2075 = vmatprep.mubr.msk.f32.mxu1 %vm393_vm1, %v743_v37 }
 0x25c   :  { %v745_v59 = vmul.f32 %v2341_v63, %v2883_v62  ;;  %v2346_v62 = vld [vmem:[%s3365_s0 + $0x20] sm:$0xff] }
 0x25e   :  { %2076 = vmatmul.mubr.msk.f32.gmra.mrb[30].mxu1 %vm393_vm1, %v745_v59 }
 0x25f   :  { %2086 = vmatprep.mubr.msk.f32.mxu1 %vm71_vm0, %v2342_v16 }
 0x262   :  { %2087 = vmatmul.mubr.msk.f32.vlgmr.msra.gmra.mrb[32].mxu1 %vm71_vm0, %v2343_v49 }
 0x263   :  { %2089 = vmatprep.mubr.msk.f32.mxu1 %vm71_vm0, %v2344_v46 }
 0x266   :  { %2090 = vmatmul.mubr.msk.f32.gmra.mrb[34].mxu1 %vm71_vm0, %v2345_v13 }
 0x267   :  { %2092 = vmatprep.mubr.msk.f32.mxu1 %vm71_vm0, %v2346_v62 }
 0x26a   :  { %2093 = vmatmul.mubr.msk.f32.gmra.mrb[36].mxu1 %vm71_vm0, %v2347_v21 }
 0x26b   :  { %2095 = vmatprep.mubr.msk.f32.mxu1 %vm71_vm0, %v2348_v25 }
 0x26e   :  { %2096 = vmatmul.mubr.msk.f32.gmra.mrb[38].mxu1 %vm71_vm0, %v2349_v44 }
 0x26f   :  { %2098 = vmatprep.mubr.msk.f32.mxu1 %vm71_vm0, %v2350_v50 }
 0x272   :  { %2099 = vmatmul.mubr.msk.f32.gmra.mrb[40].mxu1 %vm71_vm0, %v2351_v22 }
 0x273   :  { %2101 = vmatprep.mubr.msk.f32.mxu1 %vm71_vm0, %v2352_v27 }
 0x276   :  { %2102 = vmatmul.mubr.msk.f32.gmra.mrb[42].mxu1 %vm71_vm0, %v2353_v28 }
 0x277   :  { %2104 = vmatprep.mubr.msk.f32.mxu1 %vm71_vm0, %v2354_v2 }
 0x27a   :  { %2105 = vmatmul.mubr.msk.f32.gmra.mrb[44].mxu1 %vm71_vm0, %v2355_v60 }
 0x27b   :  { %2107 = vmatprep.mubr.msk.f32.mxu1 %vm71_vm0, %v2356_v47 }
 0x27e   :  { %2108 = vmatmul.mubr.msk.f32.gmra.mrb[46].mxu1 %vm71_vm0, %v2357_v9 }
 0x27f   :  { %2110 = vmatprep.mubr.msk.f32.mxu1 %vm71_vm0, %v2358_v6 }
 0x282   :  { %2111 = vmatmul.mubr.msk.f32.gmra.mrb[48].mxu1 %vm71_vm0, %v2359_v38 }
 0x283   :  { %2113 = vmatprep.mubr.msk.f32.mxu1 %vm71_vm0, %v2360_v31 }
 0x286   :  { %2114 = vmatmul.mubr.msk.f32.gmra.mrb[50].mxu1 %vm71_vm0, %v2361_v8 }
 0x287   :  { %2116 = vmatprep.mubr.msk.f32.mxu1 %vm71_vm0, %v2362_v15 }
 0x28a   :  { %2117 = vmatmul.mubr.msk.f32.gmra.mrb[52].mxu1 %vm71_vm0, %v2363_v33 }
 0x28b   :  { %2119 = vmatprep.mubr.msk.f32.mxu1 %vm71_vm0, %v2364_v35 }
 0x28e   :  { %2120 = vmatmul.mubr.msk.f32.gmra.mrb[54].mxu1 %vm71_vm0, %v2365_v10 }
 0x28f   :  { %2122 = vmatprep.mubr.msk.f32.mxu1 %vm71_vm0, %v2366_v20 }
 0x292   :  { %2123 = vmatmul.mubr.msk.f32.gmra.mrb[56].mxu1 %vm71_vm0, %v2367_v26 }
 0x293   :  { %2125 = vmatprep.mubr.msk.f32.mxu1 %vm71_vm0, %v2368_v1 }
 0x296   :  { %2126 = vmatmul.mubr.msk.f32.gmra.mrb[58].mxu1 %vm71_vm0, %v2369_v42 }
 0x297   :  { %2128 = vmatprep.mubr.msk.f32.mxu1 %vm71_vm0, %v2370_v7 }
 0x29a   :  { %2129 = vmatmul.mubr.msk.f32.gmra.mrb[60].mxu1 %vm71_vm0, %v2371_v43 }
 0x29b   :  { %2131 = vmatprep.mubr.msk.f32.mxu1 %vm71_vm0, %v2372_v45 }
 0x29e   :  { %2132 = vmatmul.mubr.msk.f32.gmra.mrb[62].mxu1 %vm71_vm0, %v2373_v39 }
 0x2f5   :  { %v2032_v12 = vpop.f32.mrb[0].mxu1 }
 0x2f6   :  { %v909_v41 = vpop.f32.mrb[1].mxu1 }
 0x2f7   :  { %2142 = vmatprep.mubr.msk.f32.mxu0 %vm71_vm0, %v909_v41 }
 0x2f8   :  { %2143 = vmatmul.mubr.msk.f32.vlgmr.msra.gmra.mrb[32].mxu0 %vm71_vm0, %v2032_v12  ;;  %v3234_v12 = vld [vmem:[%s3371_s6] ss:$0 sm:$0xff] }
 0x2f9   :  { %v2035_v51 = vpop.f32.mrb[2].mxu1 }
 0x2fa   :  { %v919_v57 = vpop.f32.mrb[3].mxu1 }
 0x2fb   :  { %2145 = vmatprep.mubr.msk.f32.mxu0 %vm71_vm0, %v919_v57 }
 0x2fc   :  { %2146 = vmatmul.mubr.msk.f32.gmra.mrb[34].mxu0 %vm71_vm0, %v2035_v51 }
 0x2fd   :  { %v2038_v61 = vpop.f32.mrb[4].mxu1 }
 0x2fe   :  { %v929_v54 = vpop.f32.mrb[5].mxu1 }
 0x2ff   :  { %2148 = vmatprep.mubr.msk.f32.mxu0 %vm71_vm0, %v929_v54 }
 0x300   :  { %2149 = vmatmul.mubr.msk.f32.gmra.mrb[36].mxu0 %vm71_vm0, %v2038_v61 }
 0x301   :  { %v2041_v18 = vpop.f32.mrb[6].mxu1 }
 0x302   :  { %v939_v53 = vpop.f32.mrb[7].mxu1 }
 0x303   :  { %2151 = vmatprep.mubr.msk.f32.mxu0 %vm71_vm0, %v939_v53 }
 0x304   :  { %2152 = vmatmul.mubr.msk.f32.gmra.mrb[38].mxu0 %vm71_vm0, %v2041_v18 }
 0x305   :  { %v2044_v5 = vpop.f32.mrb[8].mxu1 }
 0x306   :  { %v949_v48 = vpop.f32.mrb[9].mxu1 }
 0x307   :  { %2154 = vmatprep.mubr.msk.f32.mxu0 %vm71_vm0, %v949_v48 }
 0x308   :  { %2155 = vmatmul.mubr.msk.f32.gmra.mrb[40].mxu0 %vm71_vm0, %v2044_v5 }
 0x309   :  { %v2047_v55 = vpop.f32.mrb[10].mxu1 }
 0x30a   :  { %v959_v3 = vpop.f32.mrb[11].mxu1 }
 0x30b   :  { %2157 = vmatprep.mubr.msk.f32.mxu0 %vm71_vm0, %v959_v3 }
 0x30c   :  { %2158 = vmatmul.mubr.msk.f32.gmra.mrb[42].mxu0 %vm71_vm0, %v2047_v55 }
 0x30d   :  { %v2050_v24 = vpop.f32.mrb[12].mxu1 }
 0x30e   :  { %v969_v52 = vpop.f32.mrb[13].mxu1 }
 0x30f   :  { %2160 = vmatprep.mubr.msk.f32.mxu0 %vm71_vm0, %v969_v52 }
 0x310   :  { %2161 = vmatmul.mubr.msk.f32.gmra.mrb[44].mxu0 %vm71_vm0, %v2050_v24 }
 0x311   :  { %v2053_v58 = vpop.f32.mrb[14].mxu1 }
 0x312   :  { %v979_v19 = vpop.f32.mrb[15].mxu1 }
 0x313   :  { %2163 = vmatprep.mubr.msk.f32.mxu0 %vm71_vm0, %v979_v19 }
 0x314   :  { %2164 = vmatmul.mubr.msk.f32.gmra.mrb[46].mxu0 %vm71_vm0, %v2053_v58 }
 0x315   :  { %v2056_v17 = vpop.f32.mrb[16].mxu1 }
 0x316   :  { %v989_v0 = vpop.f32.mrb[17].mxu1 }
 0x317   :  { %2166 = vmatprep.mubr.msk.f32.mxu0 %vm71_vm0, %v989_v0 }
 0x318   :  { %2167 = vmatmul.mubr.msk.f32.gmra.mrb[48].mxu0 %vm71_vm0, %v2056_v17 }
 0x319   :  { %v2059_v30 = vpop.f32.mrb[18].mxu1 }
 0x31a   :  { %v999_v23 = vpop.f32.mrb[19].mxu1 }
 0x31b   :  { %2169 = vmatprep.mubr.msk.f32.mxu0 %vm71_vm0, %v999_v23 }
 0x31c   :  { %2170 = vmatmul.mubr.msk.f32.gmra.mrb[50].mxu0 %vm71_vm0, %v2059_v30 }
 0x31d   :  { %v2062_v4 = vpop.f32.mrb[20].mxu1 }
 0x31e   :  { %v1009_v11 = vpop.f32.mrb[21].mxu1 }
 0x31f   :  { %2172 = vmatprep.mubr.msk.f32.mxu0 %vm71_vm0, %v1009_v11 }
 0x320   :  { %2173 = vmatmul.mubr.msk.f32.gmra.mrb[52].mxu0 %vm71_vm0, %v2062_v4 }
 0x321   :  { %v2065_v14 = vpop.f32.mrb[22].mxu1 }
 0x322   :  { %v1019_v29 = vpop.f32.mrb[23].mxu1 }
 0x323   :  { %2175 = vmatprep.mubr.msk.f32.mxu0 %vm71_vm0, %v1019_v29 }
 0x324   :  { %2176 = vmatmul.mubr.msk.f32.gmra.mrb[54].mxu0 %vm71_vm0, %v2065_v14 }
 0x325   :  { %v2068_v36 = vpop.f32.mrb[24].mxu1 }
 0x326   :  { %v1029_v56 = vpop.f32.mrb[25].mxu1 }
 0x327   :  { %2178 = vmatprep.mubr.msk.f32.mxu0 %vm71_vm0, %v1029_v56 }
 0x328   :  { %2179 = vmatmul.mubr.msk.f32.gmra.mrb[56].mxu0 %vm71_vm0, %v2068_v36 }
 0x329   :  { %v2071_v32 = vpop.f32.mrb[26].mxu1 }
 0x32a   :  { %v1039_v34 = vpop.f32.mrb[27].mxu1 }
 0x32b   :  { %2181 = vmatprep.mubr.msk.f32.mxu0 %vm71_vm0, %v1039_v34 }
 0x32c   :  { %2182 = vmatmul.mubr.msk.f32.gmra.mrb[58].mxu0 %vm71_vm0, %v2071_v32 }
 0x32d   :  { %v2074_v40 = vpop.f32.mrb[28].mxu1 }
 0x32e   :  { %v1049_v37 = vpop.f32.mrb[29].mxu1 }
 0x32f   :  { %2184 = vmatprep.mubr.msk.f32.mxu0 %vm71_vm0, %v1049_v37 }
 0x330   :  { %2185 = vmatmul.mubr.msk.f32.gmra.mrb[60].mxu0 %vm71_vm0, %v2074_v40 }
 0x331   :  { %v2077_v63 = vpop.f32.mrb[30].mxu1 }
 0x332   :  { %v1059_v59 = vpop.f32.mrb[31].mxu1 }
 0x333   :  { %2187 = vmatprep.mubr.msk.f32.mxu0 %vm71_vm0, %v1059_v59 }
 0x334   :  { %2188 = vmatmul.mubr.msk.f32.gmra.mrb[62].mxu0 %vm71_vm0, %v2077_v63 }
 0x335   :  { %v2088_v16 = vpop.f32.mrb[32].mxu1 }
 0x336   :  { %v1138_v49 = vpop.f32.mrb[33].mxu1  ;;  %1298 = vst [vmem:[%s3370_s7 + $0x8] sm:$0xff] %v2088_v16 }
 0x337   :  { %1297 = vst [vmem:[%s3370_s7] sm:$0xff] %v1138_v49 }
 0x339   :  { %v2091_v46 = vpop.f32.mrb[34].mxu1 }
 0x33a   :  { %1300 = vst [vmem:[%s3370_s7 + $0x18] sm:$0xff] %v2091_v46  ;;  %v1148_v13 = vpop.f32.mrb[35].mxu1 }
 0x33b   :  { %1299 = vst [vmem:[%s3370_s7 + $0x10] sm:$0xff] %v1148_v13 }
 0x33d   :  { %v2094_v62 = vpop.f32.mrb[36].mxu1 }
 0x33e   :  { %1302 = vst [vmem:[%s3370_s7 + $0x28] sm:$0xff] %v2094_v62  ;;  %v1158_v21 = vpop.f32.mrb[37].mxu1 }
 0x33f   :  { %1301 = vst [vmem:[%s3370_s7 + $0x20] sm:$0xff] %v1158_v21 }
 0x341   :  { %v2097_v25 = vpop.f32.mrb[38].mxu1 }
 0x342   :  { %1304 = vst [vmem:[%s3370_s7 + $0x38] sm:$0xff] %v2097_v25  ;;  %v1168_v44 = vpop.f32.mrb[39].mxu1 }
 0x343   :  { %1303 = vst [vmem:[%s3370_s7 + $0x30] sm:$0xff] %v1168_v44 }
 0x345   :  { %v2100_v50 = vpop.f32.mrb[40].mxu1 }
 0x346   :  { %1306 = vst [vmem:[%s3370_s7 + $0x48] sm:$0xff] %v2100_v50  ;;  %v1178_v22 = vpop.f32.mrb[41].mxu1 }
 0x347   :  { %1305 = vst [vmem:[%s3370_s7 + $0x40] sm:$0xff] %v1178_v22 }
 0x349   :  { %v2103_v27 = vpop.f32.mrb[42].mxu1 }
 0x34a   :  { %1308 = vst [vmem:[%s3370_s7 + $0x58] sm:$0xff] %v2103_v27  ;;  %v1188_v28 = vpop.f32.mrb[43].mxu1 }
 0x34b   :  { %1307 = vst [vmem:[%s3370_s7 + $0x50] sm:$0xff] %v1188_v28 }
 0x34d   :  { %v2106_v2 = vpop.f32.mrb[44].mxu1 }
 0x34e   :  { %1310 = vst [vmem:[%s3370_s7 + $0x68] sm:$0xff] %v2106_v2  ;;  %v1198_v60 = vpop.f32.mrb[45].mxu1 }
 0x34f   :  { %1309 = vst [vmem:[%s3370_s7 + $0x60] sm:$0xff] %v1198_v60 }
 0x351   :  { %v2109_v47 = vpop.f32.mrb[46].mxu1 }
 0x352   :  { %1312 = vst [vmem:[%s3370_s7 + $0x78] sm:$0xff] %v2109_v47  ;;  %v1208_v9 = vpop.f32.mrb[47].mxu1 }
 0x353   :  { %1311 = vst [vmem:[%s3370_s7 + $0x70] sm:$0xff] %v1208_v9 }
 0x355   :  { %v2112_v6 = vpop.f32.mrb[48].mxu1 }
 0x356   :  { %1314 = vst [vmem:[%s3370_s7 + $0x88] sm:$0xff] %v2112_v6  ;;  %v1218_v38 = vpop.f32.mrb[49].mxu1 }
 0x357   :  { %1313 = vst [vmem:[%s3370_s7 + $0x80] sm:$0xff] %v1218_v38 }
 0x359   :  { %v2115_v31 = vpop.f32.mrb[50].mxu1 }
 0x35a   :  { %1316 = vst [vmem:[%s3370_s7 + $0x98] sm:$0xff] %v2115_v31  ;;  %v1228_v8 = vpop.f32.mrb[51].mxu1 }
 0x35b   :  { %1315 = vst [vmem:[%s3370_s7 + $0x90] sm:$0xff] %v1228_v8 }
 0x35d   :  { %v2118_v15 = vpop.f32.mrb[52].mxu1 }
 0x35e   :  { %1318 = vst [vmem:[%s3370_s7 + $0xa8] sm:$0xff] %v2118_v15  ;;  %v1238_v33 = vpop.f32.mrb[53].mxu1 }
 0x35f   :  { %1317 = vst [vmem:[%s3370_s7 + $0xa0] sm:$0xff] %v1238_v33 }
 0x361   :  { %v2121_v35 = vpop.f32.mrb[54].mxu1 }
 0x362   :  { %1320 = vst [vmem:[%s3370_s7 + $0xb8] sm:$0xff] %v2121_v35  ;;  %v1248_v10 = vpop.f32.mrb[55].mxu1 }
 0x363   :  { %1319 = vst [vmem:[%s3370_s7 + $0xb0] sm:$0xff] %v1248_v10 }
 0x365   :  { %v2124_v20 = vpop.f32.mrb[56].mxu1 }
 0x366   :  { %1322 = vst [vmem:[%s3370_s7 + $0xc8] sm:$0xff] %v2124_v20  ;;  %v1258_v26 = vpop.f32.mrb[57].mxu1 }
 0x367   :  { %1321 = vst [vmem:[%s3370_s7 + $0xc0] sm:$0xff] %v1258_v26 }
 0x369   :  { %v2127_v1 = vpop.f32.mrb[58].mxu1 }
 0x36a   :  { %1324 = vst [vmem:[%s3370_s7 + $0xd8] sm:$0xff] %v2127_v1  ;;  %v1268_v42 = vpop.f32.mrb[59].mxu1 }
 0x36b   :  { %1323 = vst [vmem:[%s3370_s7 + $0xd0] sm:$0xff] %v1268_v42 }
 0x36d   :  { %v2130_v7 = vpop.f32.mrb[60].mxu1 }
 0x36e   :  { %1326 = vst [vmem:[%s3370_s7 + $0xe8] sm:$0xff] %v2130_v7  ;;  %v1278_v43 = vpop.f32.mrb[61].mxu1 }
 0x36f   :  { %1325 = vst [vmem:[%s3370_s7 + $0xe0] sm:$0xff] %v1278_v43 }
 0x371   :  { %v2133_v45 = vpop.f32.mrb[62].mxu1 }
 0x372   :  { %1328 = vst [vmem:[%s3370_s7 + $0xf8] sm:$0xff] %v2133_v45  ;;  %v1288_v39 = vpop.f32.mrb[63].mxu1 }
 0x373   :  { %1327 = vst [vmem:[%s3370_s7 + $0xf0] sm:$0xff] %v1288_v39 }
 0x3cb   :  { %v2144_v41 = vpop.f32.mrb[32].mxu0 }
 0x3cc   :  { %v1508_v51 = vadd.f32 %v2144_v41, %v3234_v12  ;;  %v1502_v57 = vpop.f32.mrb[33].mxu0 }
 0x3cd   :  { %v1503_v61 = vadd.f32 %v3234_v12, %v1502_v57 }
 0x3ce   :  { %1662 = vst [vmem:[%s3372_s8 + $0x8] sm:$0xff] %v1508_v51 }
 0x3cf   :  { %1661 = vst [vmem:[%s3372_s8] sm:$0xff] %v1503_v61  ;;  %v2147_v54 = vpop.f32.mrb[34].mxu0 }
 0x3d0   :  { %v1518_v18 = vadd.f32 %v2147_v54, %v3234_v12  ;;  %v1512_v53 = vpop.f32.mrb[35].mxu0 }
 0x3d1   :  { %v1513_v5 = vadd.f32 %v3234_v12, %v1512_v53 }
 0x3d2   :  { %1664 = vst [vmem:[%s3372_s8 + $0x18] sm:$0xff] %v1518_v18 }
 0x3d3   :  { %1663 = vst [vmem:[%s3372_s8 + $0x10] sm:$0xff] %v1513_v5  ;;  %v2150_v48 = vpop.f32.mrb[36].mxu0 }
 0x3d4   :  { %v1528_v55 = vadd.f32 %v2150_v48, %v3234_v12  ;;  %v1522_v3 = vpop.f32.mrb[37].mxu0 }
 0x3d5   :  { %v1523_v24 = vadd.f32 %v3234_v12, %v1522_v3 }
 0x3d6   :  { %1666 = vst [vmem:[%s3372_s8 + $0x28] sm:$0xff] %v1528_v55 }
 0x3d7   :  { %1665 = vst [vmem:[%s3372_s8 + $0x20] sm:$0xff] %v1523_v24  ;;  %v2153_v52 = vpop.f32.mrb[38].mxu0 }
 0x3d8   :  { %v1538_v58 = vadd.f32 %v2153_v52, %v3234_v12  ;;  %v1532_v19 = vpop.f32.mrb[39].mxu0 }
 0x3d9   :  { %v1533_v17 = vadd.f32 %v3234_v12, %v1532_v19 }
 0x3da   :  { %1668 = vst [vmem:[%s3372_s8 + $0x38] sm:$0xff] %v1538_v58 }
 0x3db   :  { %1667 = vst [vmem:[%s3372_s8 + $0x30] sm:$0xff] %v1533_v17  ;;  %v2156_v0 = vpop.f32.mrb[40].mxu0 }
 0x3dc   :  { %v1548_v30 = vadd.f32 %v2156_v0, %v3234_v12  ;;  %v1542_v23 = vpop.f32.mrb[41].mxu0 }
 0x3dd   :  { %v1543_v4 = vadd.f32 %v3234_v12, %v1542_v23 }
 0x3de   :  { %1670 = vst [vmem:[%s3372_s8 + $0x48] sm:$0xff] %v1548_v30 }
 0x3df   :  { %1669 = vst [vmem:[%s3372_s8 + $0x40] sm:$0xff] %v1543_v4  ;;  %v2159_v11 = vpop.f32.mrb[42].mxu0 }
 0x3e0   :  { %v1558_v14 = vadd.f32 %v2159_v11, %v3234_v12  ;;  %v1552_v29 = vpop.f32.mrb[43].mxu0 }
 0x3e1   :  { %v1553_v36 = vadd.f32 %v3234_v12, %v1552_v29 }
 0x3e2   :  { %1672 = vst [vmem:[%s3372_s8 + $0x58] sm:$0xff] %v1558_v14 }
 0x3e3   :  { %1671 = vst [vmem:[%s3372_s8 + $0x50] sm:$0xff] %v1553_v36  ;;  %v2162_v56 = vpop.f32.mrb[44].mxu0 }
 0x3e4   :  { %v1568_v32 = vadd.f32 %v2162_v56, %v3234_v12  ;;  %v1562_v34 = vpop.f32.mrb[45].mxu0 }
 0x3e5   :  { %v1563_v40 = vadd.f32 %v3234_v12, %v1562_v34 }
 0x3e6   :  { %1674 = vst [vmem:[%s3372_s8 + $0x68] sm:$0xff] %v1568_v32 }
 0x3e7   :  { %1673 = vst [vmem:[%s3372_s8 + $0x60] sm:$0xff] %v1563_v40  ;;  %v2165_v37 = vpop.f32.mrb[46].mxu0 }
 0x3e8   :  { %v1578_v63 = vadd.f32 %v2165_v37, %v3234_v12  ;;  %v1572_v59 = vpop.f32.mrb[47].mxu0 }
 0x3e9   :  { %v1573_v16 = vadd.f32 %v3234_v12, %v1572_v59 }
 0x3ea   :  { %1676 = vst [vmem:[%s3372_s8 + $0x78] sm:$0xff] %v1578_v63 }
 0x3eb   :  { %1675 = vst [vmem:[%s3372_s8 + $0x70] sm:$0xff] %v1573_v16  ;;  %v2168_v49 = vpop.f32.mrb[48].mxu0 }
 0x3ec   :  { %v1588_v46 = vadd.f32 %v2168_v49, %v3234_v12  ;;  %v1582_v13 = vpop.f32.mrb[49].mxu0 }
 0x3ed   :  { %v1583_v62 = vadd.f32 %v3234_v12, %v1582_v13 }
 0x3ee   :  { %1678 = vst [vmem:[%s3372_s8 + $0x88] sm:$0xff] %v1588_v46 }
 0x3ef   :  { %1677 = vst [vmem:[%s3372_s8 + $0x80] sm:$0xff] %v1583_v62  ;;  %v2171_v21 = vpop.f32.mrb[50].mxu0 }
 0x3f0   :  { %v1598_v25 = vadd.f32 %v2171_v21, %v3234_v12  ;;  %v1592_v44 = vpop.f32.mrb[51].mxu0 }
 0x3f1   :  { %v1593_v50 = vadd.f32 %v3234_v12, %v1592_v44 }
 0x3f2   :  { %1680 = vst [vmem:[%s3372_s8 + $0x98] sm:$0xff] %v1598_v25 }
 0x3f3   :  { %1679 = vst [vmem:[%s3372_s8 + $0x90] sm:$0xff] %v1593_v50  ;;  %v2174_v22 = vpop.f32.mrb[52].mxu0 }
 0x3f4   :  { %v1608_v27 = vadd.f32 %v2174_v22, %v3234_v12  ;;  %v1602_v28 = vpop.f32.mrb[53].mxu0 }
 0x3f5   :  { %v1603_v2 = vadd.f32 %v3234_v12, %v1602_v28 }
 0x3f6   :  { %1682 = vst [vmem:[%s3372_s8 + $0xa8] sm:$0xff] %v1608_v27 }
 0x3f7   :  { %1681 = vst [vmem:[%s3372_s8 + $0xa0] sm:$0xff] %v1603_v2  ;;  %v2177_v60 = vpop.f32.mrb[54].mxu0 }
 0x3f8   :  { %v1618_v47 = vadd.f32 %v2177_v60, %v3234_v12  ;;  %v1612_v9 = vpop.f32.mrb[55].mxu0 }
 0x3f9   :  { %v1613_v6 = vadd.f32 %v3234_v12, %v1612_v9 }
 0x3fa   :  { %1684 = vst [vmem:[%s3372_s8 + $0xb8] sm:$0xff] %v1618_v47 }
 0x3fb   :  { %1683 = vst [vmem:[%s3372_s8 + $0xb0] sm:$0xff] %v1613_v6  ;;  %v2180_v38 = vpop.f32.mrb[56].mxu0 }
 0x3fc   :  { %v1628_v31 = vadd.f32 %v2180_v38, %v3234_v12  ;;  %v1622_v8 = vpop.f32.mrb[57].mxu0 }
 0x3fd   :  { %v1623_v15 = vadd.f32 %v3234_v12, %v1622_v8 }
 0x3fe   :  { %1686 = vst [vmem:[%s3372_s8 + $0xc8] sm:$0xff] %v1628_v31 }
 0x3ff   :  { %1685 = vst [vmem:[%s3372_s8 + $0xc0] sm:$0xff] %v1623_v15  ;;  %v2183_v33 = vpop.f32.mrb[58].mxu0 }
 0x400   :  { %v1638_v35 = vadd.f32 %v2183_v33, %v3234_v12  ;;  %v1632_v10 = vpop.f32.mrb[59].mxu0 }
 0x401   :  { %v1633_v20 = vadd.f32 %v3234_v12, %v1632_v10 }
 0x402   :  { %1688 = vst [vmem:[%s3372_s8 + $0xd8] sm:$0xff] %v1638_v35 }
 0x403   :  { %1687 = vst [vmem:[%s3372_s8 + $0xd0] sm:$0xff] %v1633_v20  ;;  %v2186_v26 = vpop.f32.mrb[60].mxu0 }
 0x404   :  { %v1648_v1 = vadd.f32 %v2186_v26, %v3234_v12  ;;  %v1642_v42 = vpop.f32.mrb[61].mxu0 }
 0x405   :  { %v1643_v7 = vadd.f32 %v3234_v12, %v1642_v42 }
 0x406   :  { %1690 = vst [vmem:[%s3372_s8 + $0xe8] sm:$0xff] %v1648_v1 }
 0x407   :  { %1689 = vst [vmem:[%s3372_s8 + $0xe0] sm:$0xff] %v1643_v7  ;;  %v2189_v43 = vpop.f32.mrb[62].mxu0 }
 0x408   :  { %v1658_v45 = vadd.f32 %v2189_v43, %v3234_v12  ;;  %v1652_v39 = vpop.f32.mrb[63].mxu0 }
 0x409   :  { %v1653_v41 = vadd.f32 %v3234_v12, %v1652_v39 }
 0x40a   :  { %1692 = vst [vmem:[%s3372_s8 + $0xf8] sm:$0xff] %v1658_v45 }
 0x40b   :  { %1691 = vst [vmem:[%s3372_s8 + $0xf0] sm:$0xff] %v1653_v41 }

</bundles_post_ra>
